<compile_context>
chip_gen: v7x
topology: tpu7x:2x2x1
jax: 0.10.0
libtpu: 0.0.40
codegen_flags: <defaults>
</compile_context>

<pallas_src>
import functools

import numpy as np
import jax
import jax.numpy as jnp
from jax.experimental import pallas as pl
from jax.experimental.pallas import tpu as pltpu

_VMEM = pl.BlockSpec(memory_space=pltpu.MemorySpace.VMEM)


def _layernorm(x, w, b, eps=1e-5):
    mu = jnp.mean(x, axis=-1, keepdims=True)
    var = jnp.mean(jnp.square(x - mu), axis=-1, keepdims=True)
    return (x - mu) * jax.lax.rsqrt(var + eps) * w + b


def _fused_forward_kernel(
        x_ref, w_emb_ref, b_emb_ref, pe_ref,
        wqkv_ref, bqkv_ref, wo_ref, bo_ref,
        ln1w_ref, ln1b_ref, w1_ref, b1_ref, w2_ref, b2_ref,
        ln2w_ref, ln2b_ref, w_out_ref, b_out_ref,
        o_ref, *, nhead, num_layers, compute_dtype):
    # x: (B, S, F) -> o: (B, F).  All layer weight refs carry a leading L axis.
    B, S, F = x_ref.shape
    D = w_emb_ref.shape[1]
    H = nhead
    hd = D // H
    qscale = 1.0 / float(np.sqrt(hd))
    emb_scale = float(np.sqrt(D))
    cd = compute_dtype

    # ---------------- embedding * sqrt(d_model) + positional encoding --------------
    x2 = x_ref[...].reshape(B * S, F)                                   # batch-major rows
    h = jnp.dot(x2.astype(cd), w_emb_ref[...].astype(cd),
                preferred_element_type=jnp.float32) + b_emb_ref[...]
    h = h * emb_scale
    pe = jnp.broadcast_to(pe_ref[...][None, :, :], (B, S, D)).reshape(B * S, D)
    h = h + pe                                                          # (B*S, D) f32

    # ---------------- encoder layers (post-LN, ReLU FFN, dropout = identity) -------
    def layer_body(l, h):
        wqkv = wqkv_ref[l]
        bqkv = bqkv_ref[l]
        wo = wo_ref[l]
        bo = bo_ref[l]
        ln1w = ln1w_ref[l]
        ln1b = ln1b_ref[l]
        w1 = w1_ref[l]
        b1 = b1_ref[l]
        w2 = w2_ref[l]
        b2 = b2_ref[l]
        ln2w = ln2w_ref[l]
        ln2b = ln2b_ref[l]

        # fused QKV projection: (B*S, 3D)
        qkv = jnp.dot(h.astype(cd), wqkv.astype(cd),
                      preferred_element_type=jnp.float32) + bqkv
        qkv3 = qkv.reshape(B, S, 3 * D)

        # gather heads into the batch dim (head-major): (H*B, S, hd)
        def heads(off):
            return jnp.concatenate(
                [qkv3[:, :, off + hh * hd: off + (hh + 1) * hd] for hh in range(H)],
                axis=0)

        qh = heads(0) * qscale
        kh = heads(D)
        vh = heads(2 * D)

        # one batched contraction over all (head, batch) pairs + single softmax
        sc = jnp.einsum('bqd,bkd->bqk', qh.astype(cd), kh.astype(cd),
                        preferred_element_type=jnp.float32)             # (H*B, S, S)
        sc = sc - jnp.max(sc, axis=-1, keepdims=True)
        p = jnp.exp(sc)
        p = p * pl.reciprocal(jnp.sum(p, axis=-1, keepdims=True), approx=True)
        ah = jnp.einsum('bqk,bkd->bqd', p.astype(cd), vh.astype(cd),
                        preferred_element_type=jnp.float32)             # (H*B, S, hd)

        # back to (B*S, D): lane-concatenate the per-head batch slabs
        attn = jnp.concatenate([ah[hh * B:(hh + 1) * B] for hh in range(H)],
                               axis=-1).reshape(B * S, D)
        attn_out = jnp.dot(attn.astype(cd), wo.astype(cd),
                           preferred_element_type=jnp.float32) + bo

        # residual + LayerNorm1
        h1 = _layernorm(h + attn_out, ln1w, ln1b)

        # feed-forward (ReLU) + residual + LayerNorm2
        f = jnp.dot(h1.astype(cd), w1.astype(cd),
                    preferred_element_type=jnp.float32) + b1
        f = jnp.maximum(f, 0.0)
        f = jnp.dot(f.astype(cd), w2.astype(cd),
                    preferred_element_type=jnp.float32) + b2
        return _layernorm(h1 + f, ln2w, ln2b)

    h = jax.lax.fori_loop(0, num_layers, layer_body, h, unroll=True)

    # ---------------- last sequence position + output head -------------------------
    last = h.reshape(B, S, D)[:, S - 1, :]                              # (B, D)
    o_ref[...] = jnp.dot(last.astype(cd), w_out_ref[...].astype(cd),
                         preferred_element_type=jnp.float32) + b_out_ref[...]


class CryptoTransformerPallas:
    def __init__(self, feature_dim, d_model=32, nhead=4, num_encoder_layers=2,
                 dim_feedforward=64, max_len=5000, compute_dtype=jnp.float32,
                 key=None):
        assert d_model % nhead == 0
        self.feature_dim = feature_dim
        self.d_model = d_model
        self.nhead = nhead
        self.num_layers = num_encoder_layers
        self.dim_feedforward = dim_feedforward
        self.compute_dtype = compute_dtype   # set jnp.bfloat16 for v6e/v7x MXU path

        key = key if key is not None else jax.random.PRNGKey(0)

        def init(k, shape, scale=0.05):
            return scale * jax.random.normal(k, shape, jnp.float32)

        n_keys = 4 + num_encoder_layers * 6
        keys = list(jax.random.split(key, n_keys))

        # embedding Linear(feature_dim -> d_model), stored (in, out)
        self.w_emb = init(keys.pop(0), (feature_dim, d_model))
        self.b_emb = init(keys.pop(0), (1, d_model))

        # sinusoidal positional encoding buffer (max_len, d_model)
        position = np.arange(max_len, dtype=np.float32)[:, None]
        div_term = np.exp(np.arange(0, d_model, 2, dtype=np.float32)
                          * (-np.log(10000.0) / d_model))
        pe = np.zeros((max_len, d_model), dtype=np.float32)
        pe[:, 0::2] = np.sin(position * div_term)
        pe[:, 1::2] = np.cos(position * div_term)
        self.pe = jnp.asarray(pe)

        # encoder layers -> stacked with a leading num_layers axis
        wqkv, bqkv, wo, bo = [], [], [], []
        ln1w, ln1b, w1, b1, w2, b2, ln2w, ln2b = [], [], [], [], [], [], [], []
        for _ in range(num_encoder_layers):
            wqkv.append(init(keys.pop(0), (d_model, 3 * d_model)))
            bqkv.append(jnp.zeros((1, 3 * d_model), jnp.float32))
            wo.append(init(keys.pop(0), (d_model, d_model)))
            bo.append(jnp.zeros((1, d_model), jnp.float32))
            ln1w.append(jnp.ones((1, d_model), jnp.float32))
            ln1b.append(jnp.zeros((1, d_model), jnp.float32))
            w1.append(init(keys.pop(0), (d_model, dim_feedforward)))
            b1.append(init(keys.pop(0), (1, dim_feedforward)))
            w2.append(init(keys.pop(0), (dim_feedforward, d_model)))
            b2.append(init(keys.pop(0), (1, d_model)))
            ln2w.append(jnp.ones((1, d_model), jnp.float32))
            ln2b.append(jnp.zeros((1, d_model), jnp.float32))

        stack = lambda xs: jnp.stack(xs, axis=0)
        self.wqkv, self.bqkv, self.wo, self.bo = map(stack, (wqkv, bqkv, wo, bo))
        self.ln1w, self.ln1b = stack(ln1w), stack(ln1b)
        self.w1, self.b1, self.w2, self.b2 = map(stack, (w1, b1, w2, b2))
        self.ln2w, self.ln2b = stack(ln2w), stack(ln2b)

        # output Linear(d_model -> feature_dim), stored (in, out)
        self.w_out = init(keys.pop(0), (d_model, feature_dim))
        self.b_out = init(keys.pop(0), (1, feature_dim))

    def __call__(self, src):
        # src: (batch, seq, feature_dim)  ->  (batch, feature_dim)
        B, S, _ = src.shape
        pe = self.pe[:S]                                   # (S, D)

        # Entire model (~100 KB of weights + activations) fits in VMEM on every
        # generation, so a single full-array block (no grid) is the right tiling here.
        fused = pl.pallas_call(
            functools.partial(_fused_forward_kernel,
                              nhead=self.nhead,
                              num_layers=self.num_layers,
                              compute_dtype=self.compute_dtype),
            out_shape=jax.ShapeDtypeStruct((B, self.feature_dim), jnp.float32),
            in_specs=[_VMEM] * 18,
            out_specs=_VMEM,
        )
        return fused(src, self.w_emb, self.b_emb, pe,
                     self.wqkv, self.bqkv, self.wo, self.bo,
                     self.ln1w, self.ln1b, self.w1, self.b1, self.w2, self.b2,
                     self.ln2w, self.ln2b, self.w_out, self.b_out)


if __name__ == "__main__":
    # TODO(synk): dropout layers are inference-mode identities (training parity would
    #             need in-kernel pltpu.prng_seed / prng_random_bits).
    B, S, F = 2, 8, 4
    model = CryptoTransformerPallas(
        feature_dim=F, d_model=32, nhead=4, num_encoder_layers=2,
        dim_feedforward=64, key=jax.random.PRNGKey(42))

    src = jax.random.normal(jax.random.PRNGKey(0), (B, S, F), jnp.float32)
    out = model(src)
    out = jax.block_until_ready(out)

    assert out.shape == (B, F), out.shape
    assert bool(jnp.all(jnp.isfinite(out)))
    print("KERNEL_OK")
</pallas_src>

<mosaic_0001>
module attributes {stable_mosaic.version = 11 : i64} {
  func.func @_fused_forward_kernel(%arg0: memref<2x8x4xf32, #tpu.memory_space<vmem>>, %arg1: memref<4x32xf32, #tpu.memory_space<vmem>>, %arg2: memref<1x32xf32, #tpu.memory_space<vmem>>, %arg3: memref<8x32xf32, #tpu.memory_space<vmem>>, %arg4: memref<2x32x96xf32, #tpu.memory_space<vmem>>, %arg5: memref<2x1x96xf32, #tpu.memory_space<vmem>>, %arg6: memref<2x32x32xf32, #tpu.memory_space<vmem>>, %arg7: memref<2x1x32xf32, #tpu.memory_space<vmem>>, %arg8: memref<2x1x32xf32, #tpu.memory_space<vmem>>, %arg9: memref<2x1x32xf32, #tpu.memory_space<vmem>>, %arg10: memref<2x32x64xf32, #tpu.memory_space<vmem>>, %arg11: memref<2x1x64xf32, #tpu.memory_space<vmem>>, %arg12: memref<2x64x32xf32, #tpu.memory_space<vmem>>, %arg13: memref<2x1x32xf32, #tpu.memory_space<vmem>>, %arg14: memref<2x1x32xf32, #tpu.memory_space<vmem>>, %arg15: memref<2x1x32xf32, #tpu.memory_space<vmem>>, %arg16: memref<32x4xf32, #tpu.memory_space<vmem>>, %arg17: memref<1x4xf32, #tpu.memory_space<vmem>>, %arg18: memref<2x4xf32, #tpu.memory_space<vmem>>) attributes {dimension_semantics = [], scalar_prefetch = 0 : i64, scratch_operands = 0 : i64, tpu.core_type = #tpu.core_type<tc>} {
    %c0 = arith.constant 0 : index
    %c0_0 = arith.constant 0 : index
    %c0_1 = arith.constant 0 : index
    %0 = vector.load %arg0[%c0, %c0_0, %c0_1] : memref<2x8x4xf32, #tpu.memory_space<vmem>>, vector<2x8x4xf32>
    %1 = vector.shape_cast %0 : vector<2x8x4xf32> to vector<16x4xf32>
    %c0_2 = arith.constant 0 : index
    %c0_3 = arith.constant 0 : index
    %2 = vector.load %arg1[%c0_2, %c0_3] : memref<4x32xf32, #tpu.memory_space<vmem>>, vector<4x32xf32>
    %cst = arith.constant dense<0.000000e+00> : vector<16x32xf32>
    %3 = tpu.matmul %1, %2, %cst {dimension_numbers = #tpu.dot_dimension_numbers<[1], [0], [0], [1], [0, 0, 1, 1], [], []>} : vector<16x4xf32>, vector<4x32xf32>, vector<16x32xf32> -> vector<16x32xf32>
    %c0_4 = arith.constant 0 : index
    %c0_5 = arith.constant 0 : index
    %4 = vector.load %arg2[%c0_4, %c0_5] : memref<1x32xf32, #tpu.memory_space<vmem>>, vector<1x32xf32>
    %5 = vector.broadcast %4 : vector<1x32xf32> to vector<16x32xf32>
    %6 = arith.addf %3, %5 : vector<16x32xf32>
    %cst_6 = arith.constant 5.65685415 : f32
    %7 = vector.broadcast %cst_6 : f32 to vector<16x32xf32>
    %8 = arith.mulf %6, %7 : vector<16x32xf32>
    %c0_7 = arith.constant 0 : index
    %c0_8 = arith.constant 0 : index
    %9 = vector.load %arg3[%c0_7, %c0_8] : memref<8x32xf32, #tpu.memory_space<vmem>>, vector<8x32xf32>
    %10 = vector.shape_cast %9 : vector<8x32xf32> to vector<1x8x32xf32>
    %11 = vector.shape_cast %10 : vector<1x8x32xf32> to vector<1x8x32xf32>
    %12 = vector.broadcast %11 : vector<1x8x32xf32> to vector<2x8x32xf32>
    %13 = vector.shape_cast %12 : vector<2x8x32xf32> to vector<16x32xf32>
    %14 = arith.addf %8, %13 : vector<16x32xf32>
    %c0_i32 = arith.constant 0 : i32
    %15 = arith.index_cast %c0_i32 : i32 to index
    %c0_9 = arith.constant 0 : index
    %c0_10 = arith.constant 0 : index
    %16 = vector.load %arg4[%15, %c0_9, %c0_10] : memref<2x32x96xf32, #tpu.memory_space<vmem>>, vector<1x32x96xf32>
    %17 = vector.shape_cast %16 : vector<1x32x96xf32> to vector<32x96xf32>
    %18 = arith.index_cast %c0_i32 : i32 to index
    %c0_11 = arith.constant 0 : index
    %c0_12 = arith.constant 0 : index
    %19 = vector.load %arg5[%18, %c0_11, %c0_12] : memref<2x1x96xf32, #tpu.memory_space<vmem>>, vector<1x1x96xf32>
    %20 = vector.shape_cast %19 : vector<1x1x96xf32> to vector<1x96xf32>
    %21 = arith.index_cast %c0_i32 : i32 to index
    %c0_13 = arith.constant 0 : index
    %c0_14 = arith.constant 0 : index
    %22 = vector.load %arg6[%21, %c0_13, %c0_14] : memref<2x32x32xf32, #tpu.memory_space<vmem>>, vector<1x32x32xf32>
    %23 = vector.shape_cast %22 : vector<1x32x32xf32> to vector<32x32xf32>
    %24 = arith.index_cast %c0_i32 : i32 to index
    %c0_15 = arith.constant 0 : index
    %c0_16 = arith.constant 0 : index
    %25 = vector.load %arg7[%24, %c0_15, %c0_16] : memref<2x1x32xf32, #tpu.memory_space<vmem>>, vector<1x1x32xf32>
    %26 = vector.shape_cast %25 : vector<1x1x32xf32> to vector<1x32xf32>
    %27 = arith.index_cast %c0_i32 : i32 to index
    %c0_17 = arith.constant 0 : index
    %c0_18 = arith.constant 0 : index
    %28 = vector.load %arg8[%27, %c0_17, %c0_18] : memref<2x1x32xf32, #tpu.memory_space<vmem>>, vector<1x1x32xf32>
    %29 = vector.shape_cast %28 : vector<1x1x32xf32> to vector<1x32xf32>
    %30 = arith.index_cast %c0_i32 : i32 to index
    %c0_19 = arith.constant 0 : index
    %c0_20 = arith.constant 0 : index
    %31 = vector.load %arg9[%30, %c0_19, %c0_20] : memref<2x1x32xf32, #tpu.memory_space<vmem>>, vector<1x1x32xf32>
    %32 = vector.shape_cast %31 : vector<1x1x32xf32> to vector<1x32xf32>
    %33 = arith.index_cast %c0_i32 : i32 to index
    %c0_21 = arith.constant 0 : index
    %c0_22 = arith.constant 0 : index
    %34 = vector.load %arg10[%33, %c0_21, %c0_22] : memref<2x32x64xf32, #tpu.memory_space<vmem>>, vector<1x32x64xf32>
    %35 = vector.shape_cast %34 : vector<1x32x64xf32> to vector<32x64xf32>
    %36 = arith.index_cast %c0_i32 : i32 to index
    %c0_23 = arith.constant 0 : index
    %c0_24 = arith.constant 0 : index
    %37 = vector.load %arg11[%36, %c0_23, %c0_24] : memref<2x1x64xf32, #tpu.memory_space<vmem>>, vector<1x1x64xf32>
    %38 = vector.shape_cast %37 : vector<1x1x64xf32> to vector<1x64xf32>
    %39 = arith.index_cast %c0_i32 : i32 to index
    %c0_25 = arith.constant 0 : index
    %c0_26 = arith.constant 0 : index
    %40 = vector.load %arg12[%39, %c0_25, %c0_26] : memref<2x64x32xf32, #tpu.memory_space<vmem>>, vector<1x64x32xf32>
    %41 = vector.shape_cast %40 : vector<1x64x32xf32> to vector<64x32xf32>
    %42 = arith.index_cast %c0_i32 : i32 to index
    %c0_27 = arith.constant 0 : index
    %c0_28 = arith.constant 0 : index
    %43 = vector.load %arg13[%42, %c0_27, %c0_28] : memref<2x1x32xf32, #tpu.memory_space<vmem>>, vector<1x1x32xf32>
    %44 = vector.shape_cast %43 : vector<1x1x32xf32> to vector<1x32xf32>
    %45 = arith.index_cast %c0_i32 : i32 to index
    %c0_29 = arith.constant 0 : index
    %c0_30 = arith.constant 0 : index
    %46 = vector.load %arg14[%45, %c0_29, %c0_30] : memref<2x1x32xf32, #tpu.memory_space<vmem>>, vector<1x1x32xf32>
    %47 = vector.shape_cast %46 : vector<1x1x32xf32> to vector<1x32xf32>
    %48 = arith.index_cast %c0_i32 : i32 to index
    %c0_31 = arith.constant 0 : index
    %c0_32 = arith.constant 0 : index
    %49 = vector.load %arg15[%48, %c0_31, %c0_32] : memref<2x1x32xf32, #tpu.memory_space<vmem>>, vector<1x1x32xf32>
    %50 = vector.shape_cast %49 : vector<1x1x32xf32> to vector<1x32xf32>
    %cst_33 = arith.constant dense<0.000000e+00> : vector<16x96xf32>
    %51 = tpu.matmul %14, %17, %cst_33 {dimension_numbers = #tpu.dot_dimension_numbers<[1], [0], [0], [1], [0, 0, 1, 1], [], []>} : vector<16x32xf32>, vector<32x96xf32>, vector<16x96xf32> -> vector<16x96xf32>
    %52 = vector.broadcast %20 : vector<1x96xf32> to vector<16x96xf32>
    %53 = arith.addf %51, %52 : vector<16x96xf32>
    %54 = vector.shape_cast %53 : vector<16x96xf32> to vector<2x8x96xf32>
    %55 = vector.extract_strided_slice %54 {offsets = [0, 0, 0], sizes = [2, 8, 8], strides = [1, 1, 1]} : vector<2x8x96xf32> to vector<2x8x8xf32>
    %56 = vector.extract_strided_slice %54 {offsets = [0, 0, 8], sizes = [2, 8, 8], strides = [1, 1, 1]} : vector<2x8x96xf32> to vector<2x8x8xf32>
    %57 = vector.extract_strided_slice %54 {offsets = [0, 0, 16], sizes = [2, 8, 8], strides = [1, 1, 1]} : vector<2x8x96xf32> to vector<2x8x8xf32>
    %58 = vector.extract_strided_slice %54 {offsets = [0, 0, 24], sizes = [2, 8, 8], strides = [1, 1, 1]} : vector<2x8x96xf32> to vector<2x8x8xf32>
    %59 = tpu.concatenate %55, %56, %57, %58 in 0 : vector<2x8x8xf32>, vector<2x8x8xf32>, vector<2x8x8xf32>, vector<2x8x8xf32> -> vector<8x8x8xf32>
    %cst_34 = arith.constant 0.353553385 : f32
    %60 = vector.broadcast %cst_34 : f32 to vector<8x8x8xf32>
    %61 = arith.mulf %59, %60 : vector<8x8x8xf32>
    %62 = vector.extract_strided_slice %54 {offsets = [0, 0, 32], sizes = [2, 8, 8], strides = [1, 1, 1]} : vector<2x8x96xf32> to vector<2x8x8xf32>
    %63 = vector.extract_strided_slice %54 {offsets = [0, 0, 40], sizes = [2, 8, 8], strides = [1, 1, 1]} : vector<2x8x96xf32> to vector<2x8x8xf32>
    %64 = vector.extract_strided_slice %54 {offsets = [0, 0, 48], sizes = [2, 8, 8], strides = [1, 1, 1]} : vector<2x8x96xf32> to vector<2x8x8xf32>
    %65 = vector.extract_strided_slice %54 {offsets = [0, 0, 56], sizes = [2, 8, 8], strides = [1, 1, 1]} : vector<2x8x96xf32> to vector<2x8x8xf32>
    %66 = tpu.concatenate %62, %63, %64, %65 in 0 : vector<2x8x8xf32>, vector<2x8x8xf32>, vector<2x8x8xf32>, vector<2x8x8xf32> -> vector<8x8x8xf32>
    %67 = vector.extract_strided_slice %54 {offsets = [0, 0, 64], sizes = [2, 8, 8], strides = [1, 1, 1]} : vector<2x8x96xf32> to vector<2x8x8xf32>
    %68 = vector.extract_strided_slice %54 {offsets = [0, 0, 72], sizes = [2, 8, 8], strides = [1, 1, 1]} : vector<2x8x96xf32> to vector<2x8x8xf32>
    %69 = vector.extract_strided_slice %54 {offsets = [0, 0, 80], sizes = [2, 8, 8], strides = [1, 1, 1]} : vector<2x8x96xf32> to vector<2x8x8xf32>
    %70 = vector.extract_strided_slice %54 {offsets = [0, 0, 88], sizes = [2, 8, 8], strides = [1, 1, 1]} : vector<2x8x96xf32> to vector<2x8x8xf32>
    %71 = tpu.concatenate %67, %68, %69, %70 in 0 : vector<2x8x8xf32>, vector<2x8x8xf32>, vector<2x8x8xf32>, vector<2x8x8xf32> -> vector<8x8x8xf32>
    "tpu.trace_start"() <{level = 10 : i32, message = "bqd,bkd->bqk"}> : () -> ()
    %cst_35 = arith.constant dense<0.000000e+00> : vector<8x8x8xf32>
    %72 = tpu.matmul %61, %66, %cst_35 {dimension_numbers = #tpu.dot_dimension_numbers<[2], [2], [1], [1], [0, 0, 0, 1, 1, 1], [0], [0]>} : vector<8x8x8xf32>, vector<8x8x8xf32>, vector<8x8x8xf32> -> vector<8x8x8xf32>
    "tpu.trace_stop"() : () -> ()
    %cst_36 = arith.constant dense<0xFF800000> : vector<8x8xf32>
    %73 = vector.multi_reduction <maximumf>, %72, %cst_36 [2] : vector<8x8x8xf32> to vector<8x8xf32>
    %74 = vector.shape_cast %73 : vector<8x8xf32> to vector<8x8x1xf32>
    %75 = vector.broadcast %74 : vector<8x8x1xf32> to vector<8x8x8xf32>
    %76 = arith.subf %72, %75 : vector<8x8x8xf32>
    %77 = math.exp %76 : vector<8x8x8xf32>
    %cst_37 = arith.constant dense<0.000000e+00> : vector<8x8xf32>
    %78 = vector.multi_reduction <add>, %77, %cst_37 [2] : vector<8x8x8xf32> to vector<8x8xf32>
    %79 = vector.shape_cast %78 : vector<8x8xf32> to vector<8x8x1xf32>
    %80 = tpu.reciprocal %79 {approx = true} : vector<8x8x1xf32> -> vector<8x8x1xf32>
    %81 = vector.broadcast %80 : vector<8x8x1xf32> to vector<8x8x8xf32>
    %82 = arith.mulf %77, %81 : vector<8x8x8xf32>
    "tpu.trace_start"() <{level = 10 : i32, message = "bqk,bkd->bqd"}> : () -> ()
    %cst_38 = arith.constant dense<0.000000e+00> : vector<8x8x8xf32>
    %83 = tpu.matmul %82, %71, %cst_38 {dimension_numbers = #tpu.dot_dimension_numbers<[2], [1], [1], [2], [0, 0, 0, 1, 1, 2], [0], [0]>} : vector<8x8x8xf32>, vector<8x8x8xf32>, vector<8x8x8xf32> -> vector<8x8x8xf32>
    "tpu.trace_stop"() : () -> ()
    %84 = vector.extract_strided_slice %83 {offsets = [0, 0, 0], sizes = [2, 8, 8], strides = [1, 1, 1]} : vector<8x8x8xf32> to vector<2x8x8xf32>
    %85 = vector.extract_strided_slice %83 {offsets = [2, 0, 0], sizes = [2, 8, 8], strides = [1, 1, 1]} : vector<8x8x8xf32> to vector<2x8x8xf32>
    %86 = vector.extract_strided_slice %83 {offsets = [4, 0, 0], sizes = [2, 8, 8], strides = [1, 1, 1]} : vector<8x8x8xf32> to vector<2x8x8xf32>
    %87 = vector.extract_strided_slice %83 {offsets = [6, 0, 0], sizes = [2, 8, 8], strides = [1, 1, 1]} : vector<8x8x8xf32> to vector<2x8x8xf32>
    %88 = tpu.concatenate %84, %85, %86, %87 in 2 : vector<2x8x8xf32>, vector<2x8x8xf32>, vector<2x8x8xf32>, vector<2x8x8xf32> -> vector<2x8x32xf32>
    %89 = vector.shape_cast %88 : vector<2x8x32xf32> to vector<16x32xf32>
    %cst_39 = arith.constant dense<0.000000e+00> : vector<16x32xf32>
    %90 = tpu.matmul %89, %23, %cst_39 {dimension_numbers = #tpu.dot_dimension_numbers<[1], [0], [0], [1], [0, 0, 1, 1], [], []>} : vector<16x32xf32>, vector<32x32xf32>, vector<16x32xf32> -> vector<16x32xf32>
    %91 = vector.broadcast %26 : vector<1x32xf32> to vector<16x32xf32>
    %92 = arith.addf %90, %91 : vector<16x32xf32>
    %93 = arith.addf %14, %92 : vector<16x32xf32>
    %cst_40 = arith.constant dense<0.000000e+00> : vector<16xf32>
    %94 = vector.multi_reduction <add>, %93, %cst_40 [1] : vector<16x32xf32> to vector<16xf32>
    %95 = vector.shape_cast %94 : vector<16xf32> to vector<16x1xf32>
    %cst_41 = arith.constant 3.200000e+01 : f32
    %96 = vector.broadcast %cst_41 : f32 to vector<16x1xf32>
    %97 = arith.divf %95, %96 : vector<16x1xf32>
    %98 = vector.broadcast %97 : vector<16x1xf32> to vector<16x32xf32>
    %99 = arith.subf %93, %98 : vector<16x32xf32>
    %100 = arith.mulf %99, %99 : vector<16x32xf32>
    %cst_42 = arith.constant dense<0.000000e+00> : vector<16xf32>
    %101 = vector.multi_reduction <add>, %100, %cst_42 [1] : vector<16x32xf32> to vector<16xf32>
    %102 = vector.shape_cast %101 : vector<16xf32> to vector<16x1xf32>
    %cst_43 = arith.constant 3.200000e+01 : f32
    %103 = vector.broadcast %cst_43 : f32 to vector<16x1xf32>
    %104 = arith.divf %102, %103 : vector<16x1xf32>
    %105 = vector.broadcast %97 : vector<16x1xf32> to vector<16x32xf32>
    %106 = arith.subf %93, %105 : vector<16x32xf32>
    %cst_44 = arith.constant 9.99999974E-6 : f32
    %107 = vector.broadcast %cst_44 : f32 to vector<16x1xf32>
    %108 = arith.addf %104, %107 : vector<16x1xf32>
    %109 = math.rsqrt %108 : vector<16x1xf32>
    %110 = vector.broadcast %109 : vector<16x1xf32> to vector<16x32xf32>
    %111 = arith.mulf %106, %110 : vector<16x32xf32>
    %112 = vector.broadcast %29 : vector<1x32xf32> to vector<16x32xf32>
    %113 = arith.mulf %111, %112 : vector<16x32xf32>
    %114 = vector.broadcast %32 : vector<1x32xf32> to vector<16x32xf32>
    %115 = arith.addf %113, %114 : vector<16x32xf32>
    %cst_45 = arith.constant dense<0.000000e+00> : vector<16x64xf32>
    %116 = tpu.matmul %115, %35, %cst_45 {dimension_numbers = #tpu.dot_dimension_numbers<[1], [0], [0], [1], [0, 0, 1, 1], [], []>} : vector<16x32xf32>, vector<32x64xf32>, vector<16x64xf32> -> vector<16x64xf32>
    %117 = vector.broadcast %38 : vector<1x64xf32> to vector<16x64xf32>
    %118 = arith.addf %116, %117 : vector<16x64xf32>
    %cst_46 = arith.constant 0.000000e+00 : f32
    %119 = vector.broadcast %cst_46 : f32 to vector<16x64xf32>
    %120 = arith.maximumf %118, %119 : vector<16x64xf32>
    %cst_47 = arith.constant dense<0.000000e+00> : vector<16x32xf32>
    %121 = tpu.matmul %120, %41, %cst_47 {dimension_numbers = #tpu.dot_dimension_numbers<[1], [0], [0], [1], [0, 0, 1, 1], [], []>} : vector<16x64xf32>, vector<64x32xf32>, vector<16x32xf32> -> vector<16x32xf32>
    %122 = vector.broadcast %44 : vector<1x32xf32> to vector<16x32xf32>
    %123 = arith.addf %121, %122 : vector<16x32xf32>
    %124 = arith.addf %115, %123 : vector<16x32xf32>
    %cst_48 = arith.constant dense<0.000000e+00> : vector<16xf32>
    %125 = vector.multi_reduction <add>, %124, %cst_48 [1] : vector<16x32xf32> to vector<16xf32>
    %126 = vector.shape_cast %125 : vector<16xf32> to vector<16x1xf32>
    %cst_49 = arith.constant 3.200000e+01 : f32
    %127 = vector.broadcast %cst_49 : f32 to vector<16x1xf32>
    %128 = arith.divf %126, %127 : vector<16x1xf32>
    %129 = vector.broadcast %128 : vector<16x1xf32> to vector<16x32xf32>
    %130 = arith.subf %124, %129 : vector<16x32xf32>
    %131 = arith.mulf %130, %130 : vector<16x32xf32>
    %cst_50 = arith.constant dense<0.000000e+00> : vector<16xf32>
    %132 = vector.multi_reduction <add>, %131, %cst_50 [1] : vector<16x32xf32> to vector<16xf32>
    %133 = vector.shape_cast %132 : vector<16xf32> to vector<16x1xf32>
    %cst_51 = arith.constant 3.200000e+01 : f32
    %134 = vector.broadcast %cst_51 : f32 to vector<16x1xf32>
    %135 = arith.divf %133, %134 : vector<16x1xf32>
    %136 = vector.broadcast %128 : vector<16x1xf32> to vector<16x32xf32>
    %137 = arith.subf %124, %136 : vector<16x32xf32>
    %cst_52 = arith.constant 9.99999974E-6 : f32
    %138 = vector.broadcast %cst_52 : f32 to vector<16x1xf32>
    %139 = arith.addf %135, %138 : vector<16x1xf32>
    %140 = math.rsqrt %139 : vector<16x1xf32>
    %141 = vector.broadcast %140 : vector<16x1xf32> to vector<16x32xf32>
    %142 = arith.mulf %137, %141 : vector<16x32xf32>
    %143 = vector.broadcast %47 : vector<1x32xf32> to vector<16x32xf32>
    %144 = arith.mulf %142, %143 : vector<16x32xf32>
    %145 = vector.broadcast %50 : vector<1x32xf32> to vector<16x32xf32>
    %146 = arith.addf %144, %145 : vector<16x32xf32>
    %c1_i32 = arith.constant 1 : i32
    %147 = arith.index_cast %c1_i32 : i32 to index
    %c0_53 = arith.constant 0 : index
    %c0_54 = arith.constant 0 : index
    %148 = vector.load %arg4[%147, %c0_53, %c0_54] : memref<2x32x96xf32, #tpu.memory_space<vmem>>, vector<1x32x96xf32>
    %149 = vector.shape_cast %148 : vector<1x32x96xf32> to vector<32x96xf32>
    %150 = arith.index_cast %c1_i32 : i32 to index
    %c0_55 = arith.constant 0 : index
    %c0_56 = arith.constant 0 : index
    %151 = vector.load %arg5[%150, %c0_55, %c0_56] : memref<2x1x96xf32, #tpu.memory_space<vmem>>, vector<1x1x96xf32>
    %152 = vector.shape_cast %151 : vector<1x1x96xf32> to vector<1x96xf32>
    %153 = arith.index_cast %c1_i32 : i32 to index
    %c0_57 = arith.constant 0 : index
    %c0_58 = arith.constant 0 : index
    %154 = vector.load %arg6[%153, %c0_57, %c0_58] : memref<2x32x32xf32, #tpu.memory_space<vmem>>, vector<1x32x32xf32>
    %155 = vector.shape_cast %154 : vector<1x32x32xf32> to vector<32x32xf32>
    %156 = arith.index_cast %c1_i32 : i32 to index
    %c0_59 = arith.constant 0 : index
    %c0_60 = arith.constant 0 : index
    %157 = vector.load %arg7[%156, %c0_59, %c0_60] : memref<2x1x32xf32, #tpu.memory_space<vmem>>, vector<1x1x32xf32>
    %158 = vector.shape_cast %157 : vector<1x1x32xf32> to vector<1x32xf32>
    %159 = arith.index_cast %c1_i32 : i32 to index
    %c0_61 = arith.constant 0 : index
    %c0_62 = arith.constant 0 : index
    %160 = vector.load %arg8[%159, %c0_61, %c0_62] : memref<2x1x32xf32, #tpu.memory_space<vmem>>, vector<1x1x32xf32>
    %161 = vector.shape_cast %160 : vector<1x1x32xf32> to vector<1x32xf32>
    %162 = arith.index_cast %c1_i32 : i32 to index
    %c0_63 = arith.constant 0 : index
    %c0_64 = arith.constant 0 : index
    %163 = vector.load %arg9[%162, %c0_63, %c0_64] : memref<2x1x32xf32, #tpu.memory_space<vmem>>, vector<1x1x32xf32>
    %164 = vector.shape_cast %163 : vector<1x1x32xf32> to vector<1x32xf32>
    %165 = arith.index_cast %c1_i32 : i32 to index
    %c0_65 = arith.constant 0 : index
    %c0_66 = arith.constant 0 : index
    %166 = vector.load %arg10[%165, %c0_65, %c0_66] : memref<2x32x64xf32, #tpu.memory_space<vmem>>, vector<1x32x64xf32>
    %167 = vector.shape_cast %166 : vector<1x32x64xf32> to vector<32x64xf32>
    %168 = arith.index_cast %c1_i32 : i32 to index
    %c0_67 = arith.constant 0 : index
    %c0_68 = arith.constant 0 : index
    %169 = vector.load %arg11[%168, %c0_67, %c0_68] : memref<2x1x64xf32, #tpu.memory_space<vmem>>, vector<1x1x64xf32>
    %170 = vector.shape_cast %169 : vector<1x1x64xf32> to vector<1x64xf32>
    %171 = arith.index_cast %c1_i32 : i32 to index
    %c0_69 = arith.constant 0 : index
    %c0_70 = arith.constant 0 : index
    %172 = vector.load %arg12[%171, %c0_69, %c0_70] : memref<2x64x32xf32, #tpu.memory_space<vmem>>, vector<1x64x32xf32>
    %173 = vector.shape_cast %172 : vector<1x64x32xf32> to vector<64x32xf32>
    %174 = arith.index_cast %c1_i32 : i32 to index
    %c0_71 = arith.constant 0 : index
    %c0_72 = arith.constant 0 : index
    %175 = vector.load %arg13[%174, %c0_71, %c0_72] : memref<2x1x32xf32, #tpu.memory_space<vmem>>, vector<1x1x32xf32>
    %176 = vector.shape_cast %175 : vector<1x1x32xf32> to vector<1x32xf32>
    %177 = arith.index_cast %c1_i32 : i32 to index
    %c0_73 = arith.constant 0 : index
    %c0_74 = arith.constant 0 : index
    %178 = vector.load %arg14[%177, %c0_73, %c0_74] : memref<2x1x32xf32, #tpu.memory_space<vmem>>, vector<1x1x32xf32>
    %179 = vector.shape_cast %178 : vector<1x1x32xf32> to vector<1x32xf32>
    %180 = arith.index_cast %c1_i32 : i32 to index
    %c0_75 = arith.constant 0 : index
    %c0_76 = arith.constant 0 : index
    %181 = vector.load %arg15[%180, %c0_75, %c0_76] : memref<2x1x32xf32, #tpu.memory_space<vmem>>, vector<1x1x32xf32>
    %182 = vector.shape_cast %181 : vector<1x1x32xf32> to vector<1x32xf32>
    %cst_77 = arith.constant dense<0.000000e+00> : vector<16x96xf32>
    %183 = tpu.matmul %146, %149, %cst_77 {dimension_numbers = #tpu.dot_dimension_numbers<[1], [0], [0], [1], [0, 0, 1, 1], [], []>} : vector<16x32xf32>, vector<32x96xf32>, vector<16x96xf32> -> vector<16x96xf32>
    %184 = vector.broadcast %152 : vector<1x96xf32> to vector<16x96xf32>
    %185 = arith.addf %183, %184 : vector<16x96xf32>
    %186 = vector.shape_cast %185 : vector<16x96xf32> to vector<2x8x96xf32>
    %187 = vector.extract_strided_slice %186 {offsets = [0, 0, 0], sizes = [2, 8, 8], strides = [1, 1, 1]} : vector<2x8x96xf32> to vector<2x8x8xf32>
    %188 = vector.extract_strided_slice %186 {offsets = [0, 0, 8], sizes = [2, 8, 8], strides = [1, 1, 1]} : vector<2x8x96xf32> to vector<2x8x8xf32>
    %189 = vector.extract_strided_slice %186 {offsets = [0, 0, 16], sizes = [2, 8, 8], strides = [1, 1, 1]} : vector<2x8x96xf32> to vector<2x8x8xf32>
    %190 = vector.extract_strided_slice %186 {offsets = [0, 0, 24], sizes = [2, 8, 8], strides = [1, 1, 1]} : vector<2x8x96xf32> to vector<2x8x8xf32>
    %191 = tpu.concatenate %187, %188, %189, %190 in 0 : vector<2x8x8xf32>, vector<2x8x8xf32>, vector<2x8x8xf32>, vector<2x8x8xf32> -> vector<8x8x8xf32>
    %cst_78 = arith.constant 0.353553385 : f32
    %192 = vector.broadcast %cst_78 : f32 to vector<8x8x8xf32>
    %193 = arith.mulf %191, %192 : vector<8x8x8xf32>
    %194 = vector.extract_strided_slice %186 {offsets = [0, 0, 32], sizes = [2, 8, 8], strides = [1, 1, 1]} : vector<2x8x96xf32> to vector<2x8x8xf32>
    %195 = vector.extract_strided_slice %186 {offsets = [0, 0, 40], sizes = [2, 8, 8], strides = [1, 1, 1]} : vector<2x8x96xf32> to vector<2x8x8xf32>
    %196 = vector.extract_strided_slice %186 {offsets = [0, 0, 48], sizes = [2, 8, 8], strides = [1, 1, 1]} : vector<2x8x96xf32> to vector<2x8x8xf32>
    %197 = vector.extract_strided_slice %186 {offsets = [0, 0, 56], sizes = [2, 8, 8], strides = [1, 1, 1]} : vector<2x8x96xf32> to vector<2x8x8xf32>
    %198 = tpu.concatenate %194, %195, %196, %197 in 0 : vector<2x8x8xf32>, vector<2x8x8xf32>, vector<2x8x8xf32>, vector<2x8x8xf32> -> vector<8x8x8xf32>
    %199 = vector.extract_strided_slice %186 {offsets = [0, 0, 64], sizes = [2, 8, 8], strides = [1, 1, 1]} : vector<2x8x96xf32> to vector<2x8x8xf32>
    %200 = vector.extract_strided_slice %186 {offsets = [0, 0, 72], sizes = [2, 8, 8], strides = [1, 1, 1]} : vector<2x8x96xf32> to vector<2x8x8xf32>
    %201 = vector.extract_strided_slice %186 {offsets = [0, 0, 80], sizes = [2, 8, 8], strides = [1, 1, 1]} : vector<2x8x96xf32> to vector<2x8x8xf32>
    %202 = vector.extract_strided_slice %186 {offsets = [0, 0, 88], sizes = [2, 8, 8], strides = [1, 1, 1]} : vector<2x8x96xf32> to vector<2x8x8xf32>
    %203 = tpu.concatenate %199, %200, %201, %202 in 0 : vector<2x8x8xf32>, vector<2x8x8xf32>, vector<2x8x8xf32>, vector<2x8x8xf32> -> vector<8x8x8xf32>
    "tpu.trace_start"() <{level = 10 : i32, message = "bqd,bkd->bqk"}> : () -> ()
    %cst_79 = arith.constant dense<0.000000e+00> : vector<8x8x8xf32>
    %204 = tpu.matmul %193, %198, %cst_79 {dimension_numbers = #tpu.dot_dimension_numbers<[2], [2], [1], [1], [0, 0, 0, 1, 1, 1], [0], [0]>} : vector<8x8x8xf32>, vector<8x8x8xf32>, vector<8x8x8xf32> -> vector<8x8x8xf32>
    "tpu.trace_stop"() : () -> ()
    %cst_80 = arith.constant dense<0xFF800000> : vector<8x8xf32>
    %205 = vector.multi_reduction <maximumf>, %204, %cst_80 [2] : vector<8x8x8xf32> to vector<8x8xf32>
    %206 = vector.shape_cast %205 : vector<8x8xf32> to vector<8x8x1xf32>
    %207 = vector.broadcast %206 : vector<8x8x1xf32> to vector<8x8x8xf32>
    %208 = arith.subf %204, %207 : vector<8x8x8xf32>
    %209 = math.exp %208 : vector<8x8x8xf32>
    %cst_81 = arith.constant dense<0.000000e+00> : vector<8x8xf32>
    %210 = vector.multi_reduction <add>, %209, %cst_81 [2] : vector<8x8x8xf32> to vector<8x8xf32>
    %211 = vector.shape_cast %210 : vector<8x8xf32> to vector<8x8x1xf32>
    %212 = tpu.reciprocal %211 {approx = true} : vector<8x8x1xf32> -> vector<8x8x1xf32>
    %213 = vector.broadcast %212 : vector<8x8x1xf32> to vector<8x8x8xf32>
    %214 = arith.mulf %209, %213 : vector<8x8x8xf32>
    "tpu.trace_start"() <{level = 10 : i32, message = "bqk,bkd->bqd"}> : () -> ()
    %cst_82 = arith.constant dense<0.000000e+00> : vector<8x8x8xf32>
    %215 = tpu.matmul %214, %203, %cst_82 {dimension_numbers = #tpu.dot_dimension_numbers<[2], [1], [1], [2], [0, 0, 0, 1, 1, 2], [0], [0]>} : vector<8x8x8xf32>, vector<8x8x8xf32>, vector<8x8x8xf32> -> vector<8x8x8xf32>
    "tpu.trace_stop"() : () -> ()
    %216 = vector.extract_strided_slice %215 {offsets = [0, 0, 0], sizes = [2, 8, 8], strides = [1, 1, 1]} : vector<8x8x8xf32> to vector<2x8x8xf32>
    %217 = vector.extract_strided_slice %215 {offsets = [2, 0, 0], sizes = [2, 8, 8], strides = [1, 1, 1]} : vector<8x8x8xf32> to vector<2x8x8xf32>
    %218 = vector.extract_strided_slice %215 {offsets = [4, 0, 0], sizes = [2, 8, 8], strides = [1, 1, 1]} : vector<8x8x8xf32> to vector<2x8x8xf32>
    %219 = vector.extract_strided_slice %215 {offsets = [6, 0, 0], sizes = [2, 8, 8], strides = [1, 1, 1]} : vector<8x8x8xf32> to vector<2x8x8xf32>
    %220 = tpu.concatenate %216, %217, %218, %219 in 2 : vector<2x8x8xf32>, vector<2x8x8xf32>, vector<2x8x8xf32>, vector<2x8x8xf32> -> vector<2x8x32xf32>
    %221 = vector.shape_cast %220 : vector<2x8x32xf32> to vector<16x32xf32>
    %cst_83 = arith.constant dense<0.000000e+00> : vector<16x32xf32>
    %222 = tpu.matmul %221, %155, %cst_83 {dimension_numbers = #tpu.dot_dimension_numbers<[1], [0], [0], [1], [0, 0, 1, 1], [], []>} : vector<16x32xf32>, vector<32x32xf32>, vector<16x32xf32> -> vector<16x32xf32>
    %223 = vector.broadcast %158 : vector<1x32xf32> to vector<16x32xf32>
    %224 = arith.addf %222, %223 : vector<16x32xf32>
    %225 = arith.addf %146, %224 : vector<16x32xf32>
    %cst_84 = arith.constant dense<0.000000e+00> : vector<16xf32>
    %226 = vector.multi_reduction <add>, %225, %cst_84 [1] : vector<16x32xf32> to vector<16xf32>
    %227 = vector.shape_cast %226 : vector<16xf32> to vector<16x1xf32>
    %cst_85 = arith.constant 3.200000e+01 : f32
    %228 = vector.broadcast %cst_85 : f32 to vector<16x1xf32>
    %229 = arith.divf %227, %228 : vector<16x1xf32>
    %230 = vector.broadcast %229 : vector<16x1xf32> to vector<16x32xf32>
    %231 = arith.subf %225, %230 : vector<16x32xf32>
    %232 = arith.mulf %231, %231 : vector<16x32xf32>
    %cst_86 = arith.constant dense<0.000000e+00> : vector<16xf32>
    %233 = vector.multi_reduction <add>, %232, %cst_86 [1] : vector<16x32xf32> to vector<16xf32>
    %234 = vector.shape_cast %233 : vector<16xf32> to vector<16x1xf32>
    %cst_87 = arith.constant 3.200000e+01 : f32
    %235 = vector.broadcast %cst_87 : f32 to vector<16x1xf32>
    %236 = arith.divf %234, %235 : vector<16x1xf32>
    %237 = vector.broadcast %229 : vector<16x1xf32> to vector<16x32xf32>
    %238 = arith.subf %225, %237 : vector<16x32xf32>
    %cst_88 = arith.constant 9.99999974E-6 : f32
    %239 = vector.broadcast %cst_88 : f32 to vector<16x1xf32>
    %240 = arith.addf %236, %239 : vector<16x1xf32>
    %241 = math.rsqrt %240 : vector<16x1xf32>
    %242 = vector.broadcast %241 : vector<16x1xf32> to vector<16x32xf32>
    %243 = arith.mulf %238, %242 : vector<16x32xf32>
    %244 = vector.broadcast %161 : vector<1x32xf32> to vector<16x32xf32>
    %245 = arith.mulf %243, %244 : vector<16x32xf32>
    %246 = vector.broadcast %164 : vector<1x32xf32> to vector<16x32xf32>
    %247 = arith.addf %245, %246 : vector<16x32xf32>
    %cst_89 = arith.constant dense<0.000000e+00> : vector<16x64xf32>
    %248 = tpu.matmul %247, %167, %cst_89 {dimension_numbers = #tpu.dot_dimension_numbers<[1], [0], [0], [1], [0, 0, 1, 1], [], []>} : vector<16x32xf32>, vector<32x64xf32>, vector<16x64xf32> -> vector<16x64xf32>
    %249 = vector.broadcast %170 : vector<1x64xf32> to vector<16x64xf32>
    %250 = arith.addf %248, %249 : vector<16x64xf32>
    %cst_90 = arith.constant 0.000000e+00 : f32
    %251 = vector.broadcast %cst_90 : f32 to vector<16x64xf32>
    %252 = arith.maximumf %250, %251 : vector<16x64xf32>
    %cst_91 = arith.constant dense<0.000000e+00> : vector<16x32xf32>
    %253 = tpu.matmul %252, %173, %cst_91 {dimension_numbers = #tpu.dot_dimension_numbers<[1], [0], [0], [1], [0, 0, 1, 1], [], []>} : vector<16x64xf32>, vector<64x32xf32>, vector<16x32xf32> -> vector<16x32xf32>
    %254 = vector.broadcast %176 : vector<1x32xf32> to vector<16x32xf32>
    %255 = arith.addf %253, %254 : vector<16x32xf32>
    %256 = arith.addf %247, %255 : vector<16x32xf32>
    %cst_92 = arith.constant dense<0.000000e+00> : vector<16xf32>
    %257 = vector.multi_reduction <add>, %256, %cst_92 [1] : vector<16x32xf32> to vector<16xf32>
    %258 = vector.shape_cast %257 : vector<16xf32> to vector<16x1xf32>
    %cst_93 = arith.constant 3.200000e+01 : f32
    %259 = vector.broadcast %cst_93 : f32 to vector<16x1xf32>
    %260 = arith.divf %258, %259 : vector<16x1xf32>
    %261 = vector.broadcast %260 : vector<16x1xf32> to vector<16x32xf32>
    %262 = arith.subf %256, %261 : vector<16x32xf32>
    %263 = arith.mulf %262, %262 : vector<16x32xf32>
    %cst_94 = arith.constant dense<0.000000e+00> : vector<16xf32>
    %264 = vector.multi_reduction <add>, %263, %cst_94 [1] : vector<16x32xf32> to vector<16xf32>
    %265 = vector.shape_cast %264 : vector<16xf32> to vector<16x1xf32>
    %cst_95 = arith.constant 3.200000e+01 : f32
    %266 = vector.broadcast %cst_95 : f32 to vector<16x1xf32>
    %267 = arith.divf %265, %266 : vector<16x1xf32>
    %268 = vector.broadcast %260 : vector<16x1xf32> to vector<16x32xf32>
    %269 = arith.subf %256, %268 : vector<16x32xf32>
    %cst_96 = arith.constant 9.99999974E-6 : f32
    %270 = vector.broadcast %cst_96 : f32 to vector<16x1xf32>
    %271 = arith.addf %267, %270 : vector<16x1xf32>
    %272 = math.rsqrt %271 : vector<16x1xf32>
    %273 = vector.broadcast %272 : vector<16x1xf32> to vector<16x32xf32>
    %274 = arith.mulf %269, %273 : vector<16x32xf32>
    %275 = vector.broadcast %179 : vector<1x32xf32> to vector<16x32xf32>
    %276 = arith.mulf %274, %275 : vector<16x32xf32>
    %277 = vector.broadcast %182 : vector<1x32xf32> to vector<16x32xf32>
    %278 = arith.addf %276, %277 : vector<16x32xf32>
    %c2_i32 = arith.constant 2 : i32
    %279 = vector.shape_cast %278 : vector<16x32xf32> to vector<2x8x32xf32>
    %280 = vector.extract_strided_slice %279 {offsets = [0, 7, 0], sizes = [2, 1, 32], strides = [1, 1, 1]} : vector<2x8x32xf32> to vector<2x1x32xf32>
    %281 = vector.shape_cast %280 : vector<2x1x32xf32> to vector<2x32xf32>
    %c0_97 = arith.constant 0 : index
    %c0_98 = arith.constant 0 : index
    %282 = vector.load %arg16[%c0_97, %c0_98] : memref<32x4xf32, #tpu.memory_space<vmem>>, vector<32x4xf32>
    %cst_99 = arith.constant dense<0.000000e+00> : vector<2x4xf32>
    %283 = tpu.matmul %281, %282, %cst_99 {dimension_numbers = #tpu.dot_dimension_numbers<[1], [0], [0], [1], [0, 0, 1, 1], [], []>} : vector<2x32xf32>, vector<32x4xf32>, vector<2x4xf32> -> vector<2x4xf32>
    %c0_100 = arith.constant 0 : index
    %c0_101 = arith.constant 0 : index
    %284 = vector.load %arg17[%c0_100, %c0_101] : memref<1x4xf32, #tpu.memory_space<vmem>>, vector<1x4xf32>
    %285 = vector.broadcast %284 : vector<1x4xf32> to vector<2x4xf32>
    %286 = arith.addf %283, %285 : vector<2x4xf32>
    %c0_102 = arith.constant 0 : index
    %c0_103 = arith.constant 0 : index
    %287 = vector.load %arg18[%c0_102, %c0_103] : memref<2x4xf32, #tpu.memory_space<vmem>>, vector<2x4xf32>
    tpu.vector_store %arg18[%c0_102, %c0_103], %286 {strides = array<i32>} : memref<2x4xf32, #tpu.memory_space<vmem>>, vector<2x4xf32>,
    return
  }
}

</mosaic_0001>

<bundles_post_ra>
// kernel: tpu_custom_call.1
= control target key start
LH: loop header
LB: loop body
LE: loop exit
PB: predicated region body
PF: predicated region fallthrough
CT: control target
= control target key end

     0   :  { %s5408_s0 = inlined_call_operand.vmem [shape: f32[2,8,4], index: 0, kind: input, shape index: {}]   ;;  %s5409_s1 = inlined_call_operand.vmem [shape: f32[4,32], index: 1, kind: input, shape index: {}]   ;;  %s5410_s2 = inlined_call_operand.vmem [shape: f32[1,32], index: 2, kind: input, shape index: {}]   ;;  %s5411_s3 = inlined_call_operand.vmem [shape: f32[8,32], index: 3, kind: input, shape index: {}]   ;;  %s5412_s4 = inlined_call_operand.vmem [shape: f32[2,32,96], index: 4, kind: input, shape index: {}]   ;;  %s5413_s5 = inlined_call_operand.vmem [shape: f32[2,1,96], index: 5, kind: input, shape index: {}]   ;;  %s5414_s6 = inlined_call_operand.vmem [shape: f32[2,32,32], index: 6, kind: input, shape index: {}]   ;;  %s5415_s7 = inlined_call_operand.vmem [shape: f32[2,1,32], index: 7, kind: input, shape index: {}]   ;;  %s5416_s8 = inlined_call_operand.vmem [shape: f32[2,1,32], index: 8, kind: input, shape index: {}]   ;;  %s5417_s9 = inlined_call_operand.vmem [shape: f32[2,1,32], index: 9, kind: input, shape index: {}]   ;;  %s5418_s10 = inlined_call_operand.vmem [shape: f32[2,32,64], index: 10, kind: input, shape index: {}]   ;;  %s5419_s11 = inlined_call_operand.vmem [shape: f32[2,1,64], index: 11, kind: input, shape index: {}]   ;;  %s5420_s12 = inlined_call_operand.vmem [shape: f32[2,64,32], index: 12, kind: input, shape index: {}]   ;;  %s5421_s13 = inlined_call_operand.vmem [shape: f32[2,1,32], index: 13, kind: input, shape index: {}]   ;;  %s5422_s14 = inlined_call_operand.vmem [shape: f32[2,1,32], index: 14, kind: input, shape index: {}]   ;;  %s5423_s15 = inlined_call_operand.vmem [shape: f32[2,1,32], index: 15, kind: input, shape index: {}]   ;;  %s5424_s16 = inlined_call_operand.vmem [shape: f32[32,4], index: 16, kind: input, shape index: {}]   ;;  %s5425_s17 = inlined_call_operand.vmem [shape: f32[1,4], index: 17, kind: input, shape index: {}]   ;;  %s5426_s18 = inlined_call_operand.hbm [shape: f32[2,4], index: 18, kind: output, shape index: {}]  }
   0x1   :  { %5432 = sst [smem:[#allocation5_spill]] %s5408_s0 }
   0x2   :  { %5433 = sst [smem:[#allocation6_spill]] %s5409_s1 }
   0x3   :  { %5434 = sst [smem:[#allocation7_spill]] %s5410_s2 }
   0x4   :  { %s5435_s29 = sld [smem:[#allocation6_spill]]  ;;  %vm77_vm0 = vcmask 1043456   ;;  %s5436_s19 = sld [smem:[#allocation5_spill]]  ;;  %vm70_vm1 = vcmask 31744  }
   0xa   :  { %v62_v0 = vld [vmem:[%s5435_s29] sm:$0xf]  ;;  %v61_v2 = vld [vmem:[%s5436_s19 + $0x8] sm:$0xff] }
   0xb   :  { %v60_v1 = vld [vmem:[%s5436_s19] sm:$0xff]  ;;  %4198 = vmatprep.subr.msk.mxu0 %vm77_vm0, %v62_v0 }
   0xc   :  { %4200 = vmatprep.mubr.msk.f32.mxu0 %vm70_vm1, %v60_v1 }
   0xd   :  { %23 = vsyncpa [#allocation3], 0  ;;  %4199 = vmatpush3.msk.msra.mxu0 %vm77_vm0, %v62_v0  ;;  %v161_v3 = vld [vmem:[%s5412_s4] sm:$0xff]  ;;  %v162_v4 = vld [vmem:[%s5412_s4 + $0x8] sm:$0xff]  ;;  %s5437_s30 = sld [smem:[#allocation7_spill]]  ;;  %vm195_vm2 = vcmask 261120  }
   0xe   :  { %4201 = vmatmul.mubr.msk.f32.vlgmr.msra.gmra.mrb[0].mxu0 %vm70_vm1, %v61_v2  ;;  %v4478_v5 = vpack.c.bf16 %v162_v4, %v161_v3  ;;  %v163_v6 = vld [vmem:[%s5412_s4 + $0x10] sm:$0xff]  ;;  %v164_v7 = vld [vmem:[%s5412_s4 + $0x18] sm:$0xff]  ;;  %v158_v15 = vld [vmem:[%s5411_s3] sm:$0xff]  ;;  %v4680_v21 = vmov 0.0   ;;  %s4681_s3 = smov 112   ;;  %s4682_s21 = smov 120  }
   0xf   :  { %v4482_v8 = vpack.c.bf16 %v164_v7, %v163_v6  ;;  %v3960_v19 = vld [vmem:[%s5413_s5] ss:$0 sm:$0xff]  ;;  %4214 = vmatprep.subr.mxu0 %v4680_v21  ;;  %vm4683_vm3 = vmmov 0   ;;  %s4684_s22 = smov 104   ;;  %s4685_s2 = smov 96   ;;  %vm307_vm4 = vcmask 64512  }
  0x10   :  { %4479 = vmatprep.subr.bf16.mxu1 %v4478_v5  ;;  %4216 = vmatprep.mubr.msk.f32.mxu0 %vm4683_vm3, %v4680_v21  ;;  %s4686_s23 = smov 64   ;;  %s4687_s19 = smov 8   ;;  %vm1644_vm5 = vcmask 130048   ;;  %vm1647_vm6 = vcmask 195584   ;;  %vm1877_vm7 = vcmask 523264   ;;  %vm3866_vm8 = vcmask 1041409  }
  0x11   :  { %4481 = vmatpush3.bf16.msra.mxu1 %v4478_v5  ;;  %s5430_s1 = smov 16   ;;  %s5428_s20 = smov 24   ;;  %vm3940_vm9 = vcmask 25600  }
  0x12   :  { %4483 = vmatprep.subr.bf16.mxu1 %v4482_v8  ;;  %s5438_s25 = smov 16   ;;  %s5439_s26 = smov 24  }
  0x13   :  { %v3956_v9 = vld [vmem:[%s5437_s30] ss:$0 sm:$0xff] }
  0x15   :  { %4485 = vmatpush3.bf16.msra.mxu1 %v4482_v8 }
  0x16   :  { %4234 = vmatprep.subr.mxu1 %v4680_v21 }
  0xe1   :  { %v4202_v10 = vpop.f32.mrb[0].mxu0 }
  0xe2   :  { %v153_v11 = vadd.f32 %v4202_v10, %v3956_v9  ;;  %v147_v12 = vpop.f32.mrb[1].mxu0 }
  0xe3   :  { %v148_v13 = vadd.f32 %v3956_v9, %v147_v12 }
  0xe4   :  { %v157_v14 = vmul.f32 5.656854, %v153_v11 }
  0xe5   :  { %v156_v16 = vmul.f32 5.656854, %v148_v13 }
  0xe6   :  { %v4816_v18 = vadd.f32 %v158_v15, %v157_v14 }
  0xe7   :  { %v4814_v17 = vadd.f32 %v158_v15, %v156_v16 }
  0xe9   :  { %4211 = vmatprep.mubr.msk.f32.mxu1 %vm195_vm2, %v4814_v17 }
  0xea   :  { %4212 = vmatmul.mubr.msk.f32.vlgmr.msra.gmra.mrb[0].mxu1 %vm195_vm2, %v4816_v18 }
  0xeb   :  { %4236 = vmatprep.mubr.msk.f32.mxu1 %vm4683_vm3, %v4680_v21 }
 0x1bd   :  { %v4213_v20 = vpop.f32.mrb[0].mxu1 }
 0x1be   :  { %v268_v22 = vpop.f32.mrb[1].mxu1  ;;  %v4837_v24 = vadd.f32 %v4213_v20, %v3960_v19 }
 0x1bf   :  { %v4827_v23 = vadd.f32 %v3960_v19, %v268_v22 }
 0x1c0   :  { %v298_v34 = vmul.f32 0.35355338, %v4837_v24 }
 0x1c1   :  { %285 = vrot.lane.b32.xlu1 %v4827_v23, %s4681_s3  ;;  %279 = vrot.lane.b32.xlu0 %v4827_v23, %s4682_s21  ;;  %v297_v32 = vmul.f32 0.35355338, %v4827_v23 }
 0x1c5   :  { %287 = vrot.lane.b32.xlu1 %v4837_v24, %s4681_s3  ;;  %281 = vrot.lane.b32.xlu0 %v4837_v24, %s4682_s21 }
 0x1c9   :  { %293 = vrot.lane.b32.xlu1 %v4837_v24, %s4684_s22  ;;  %291 = vrot.lane.b32.xlu0 %v4827_v23, %s4684_s22 }
 0x1cd   :  { %383 = vrot.lane.b32.xlu1 %v4837_v24, %s4685_s2  ;;  %305 = vrot.lane.b32.xlu0 %v4827_v23, %s4685_s2 }
 0x233   :  { %v4851_v25 = vpop.permute.xlu1 %285  ;;  %v4853_v26 = vpop.permute.xlu0 %279 }
 0x234   :  { %460 = vrot.lane.b32.xlu0 %v4853_v26, %s4685_s2  ;;  %v299_v36 = vmul.f32 0.35355338, %v4853_v26  ;;  %v301_v39 = vmul.f32 0.35355338, %v4851_v25 }
 0x237   :  { %v4857_v27 = vpop.permute.xlu1 %287  ;;  %v4859_v28 = vpop.permute.xlu0 %281 }
 0x238   :  { %614 = vrot.lane.b32.xlu0 %v4851_v25, %s4685_s2  ;;  %537 = vrot.lane.b32.xlu1 %v4859_v28, %s4685_s2  ;;  %v300_v40 = vmul.f32 0.35355338, %v4859_v28  ;;  %v302_v43 = vmul.f32 0.35355338, %v4857_v27 }
 0x23b   :  { %v4865_v29 = vpop.permute.xlu0 %291  ;;  %v4871_v30 = vpop.permute.xlu1 %293 }
 0x23c   :  { %691 = vrot.lane.b32.xlu1 %v4857_v27, %s4685_s2  ;;  %768 = vrot.lane.b32.xlu0 %v4865_v29, %s4685_s2  ;;  %v303_v44 = vmul.f32 0.35355338, %v4865_v29  ;;  %v304_v46 = vmul.f32 0.35355338, %v4871_v30 }
 0x23f   :  { %v306_v31 = vpop.permute.xlu0 %305  ;;  %v384_v33 = vpop.permute.xlu1 %383 }
 0x240   :  { %845 = vrot.lane.b32.xlu1 %v4871_v30, %s4685_s2  ;;  %4215 = vmatpush3.xpose.msk.msra.mxu0 %vm307_vm4, %v306_v31 }
 0x241   :  { %4219 = vmatprep.subr.mxu0 %v4680_v21 }
 0x243   :  { %4217 = vmatmul.mubr.msk.f32.vlgmr.msra.gmra.mrb[2].mxu0 %vm307_vm4, %v297_v32 }
 0x244   :  { %4220 = vmatpush3.xpose.msk.msra.mxu0 %vm307_vm4, %v384_v33  ;;  %4221 = vmatprep.mubr.msk.f32.mxu0 %vm4683_vm3, %v4680_v21 }
 0x245   :  { %4224 = vmatprep.subr.mxu0 %v4680_v21 }
 0x247   :  { %4222 = vmatmul.mubr.msk.f32.vlgmr.msra.gmra.mrb[4].mxu0 %vm307_vm4, %v298_v34 }
 0x248   :  { %4226 = vmatprep.mubr.msk.f32.mxu0 %vm4683_vm3, %v4680_v21 }
 0x2a6   :  { %v461_v35 = vpop.permute.xlu0 %460 }
 0x2a7   :  { %4225 = vmatpush3.xpose.msk.msra.mxu0 %vm307_vm4, %v461_v35 }
 0x2a8   :  { %4229 = vmatprep.subr.mxu0 %v4680_v21 }
 0x2aa   :  { %v538_v37 = vpop.permute.xlu1 %537  ;;  %v615_v38 = vpop.permute.xlu0 %614  ;;  %4227 = vmatmul.mubr.msk.f32.vlgmr.msra.gmra.mrb[6].mxu0 %vm307_vm4, %v299_v36 }
 0x2ab   :  { %4230 = vmatpush3.xpose.msk.msra.mxu0 %vm307_vm4, %v538_v37  ;;  %4235 = vmatpush3.xpose.msk.msra.mxu1 %vm307_vm4, %v615_v38 }
 0x2ac   :  { %4231 = vmatprep.mubr.msk.f32.mxu0 %vm4683_vm3, %v4680_v21  ;;  %4244 = vmatprep.subr.mxu1 %v4680_v21 }
 0x2ad   :  { %4239 = vmatprep.subr.mxu0 %v4680_v21 }
 0x2ae   :  { %v692_v41 = vpop.permute.xlu1 %691  ;;  %4237 = vmatmul.mubr.msk.f32.vlgmr.msra.gmra.mrb[2].mxu1 %vm307_vm4, %v301_v39  ;;  %v769_v42 = vpop.permute.xlu0 %768  ;;  %4232 = vmatmul.mubr.msk.f32.vlgmr.msra.gmra.mrb[8].mxu0 %vm307_vm4, %v300_v40 }
 0x2af   :  { %4240 = vmatpush3.xpose.msk.msra.mxu0 %vm307_vm4, %v692_v41  ;;  %4245 = vmatpush3.xpose.msk.msra.mxu1 %vm307_vm4, %v769_v42 }
 0x2b0   :  { %4241 = vmatprep.mubr.msk.f32.mxu0 %vm4683_vm3, %v4680_v21  ;;  %4246 = vmatprep.mubr.msk.f32.mxu1 %vm4683_vm3, %v4680_v21 }
 0x2b1   :  { %4249 = vmatprep.subr.mxu0 %v4680_v21  ;;  %4254 = vmatprep.subr.mxu1 %v4680_v21 }
 0x2b2   :  { %v846_v45 = vpop.permute.xlu1 %845  ;;  %4242 = vmatmul.mubr.msk.f32.vlgmr.msra.gmra.mrb[10].mxu0 %vm307_vm4, %v302_v43  ;;  %4247 = vmatmul.mubr.msk.f32.vlgmr.msra.gmra.mrb[4].mxu1 %vm307_vm4, %v303_v44 }
 0x2b3   :  { %4250 = vmatpush3.xpose.msk.msra.mxu0 %vm307_vm4, %v846_v45  ;;  %4251 = vmatprep.mubr.msk.f32.mxu0 %vm4683_vm3, %v4680_v21 }
 0x2b4   :  { %4259 = vmatprep.subr.mxu0 %v4680_v21  ;;  %4256 = vmatprep.mubr.msk.f32.mxu1 %vm4683_vm3, %v4680_v21 }
 0x2b6   :  { %4252 = vmatmul.mubr.msk.f32.vlgmr.msra.gmra.mrb[12].mxu0 %vm307_vm4, %v304_v46 }
 0x2b7   :  { %4261 = vmatprep.mubr.msk.f32.mxu0 %vm4683_vm3, %v4680_v21 }
 0x316   :  { %v379_v47 = vpop.f32.mrb[2].mxu0 }
 0x317   :  { %v4218_v48 = vpop.f32.mrb[3].mxu0  ;;  %v922_v49 = vsel %vm307_vm4, %v379_v47, -inf }
 0x318   :  { %923 = vmax.xlane.f32.xlu0 %v922_v49 }
 0x31a   :  { %v456_v50 = vpop.f32.mrb[4].mxu0 }
 0x31b   :  { %v4223_v51 = vpop.f32.mrb[5].mxu0  ;;  %v925_v52 = vsel %vm307_vm4, %v456_v50, -inf }
 0x31c   :  { %926 = vmax.xlane.f32.xlu1 %v925_v52 }
 0x37d   :  { %v533_v53 = vpop.f32.mrb[6].mxu0 }
 0x37e   :  { %v4228_v54 = vpop.f32.mrb[7].mxu0  ;;  %v928_v55 = vsel %vm307_vm4, %v533_v53, -inf }
 0x37f   :  { %929 = vmax.xlane.f32.xlu0 %v928_v55 }
 0x381   :  { %v610_v56 = vpop.f32.mrb[8].mxu0  ;;  %v687_v57 = vpop.f32.mrb[2].mxu1 }
 0x382   :  { %v4233_v58 = vpop.f32.mrb[9].mxu0  ;;  %v4238_v59 = vpop.f32.mrb[3].mxu1  ;;  %v934_v60 = vsel %vm307_vm4, %v687_v57, -inf  ;;  %v931_v61 = vsel %vm307_vm4, %v610_v56, -inf }
 0x383   :  { %935 = vmax.xlane.f32.xlu1 %v934_v60  ;;  %932 = vmax.xlane.f32.xlu0 %v931_v61 }
 0x385   :  { %v764_v62 = vpop.f32.mrb[10].mxu0  ;;  %v841_v63 = vpop.f32.mrb[4].mxu1 }
 0x386   :  { %v4243_v0 = vpop.f32.mrb[11].mxu0  ;;  %v4248_v1 = vpop.f32.mrb[5].mxu1  ;;  %v940_v2 = vsel %vm307_vm4, %v841_v63, -inf  ;;  %v937_v3 = vsel %vm307_vm4, %v764_v62, -inf }
 0x387   :  { %941 = vmax.xlane.f32.xlu1 %v940_v2  ;;  %938 = vmax.xlane.f32.xlu0 %v937_v3 }
 0x389   :  { %v918_v4 = vpop.f32.mrb[12].mxu0 }
 0x38a   :  { %v4253_v5 = vpop.f32.mrb[13].mxu0  ;;  %v943_v6 = vsel %vm307_vm4, %v918_v4, -inf }
 0x38b   :  { %944 = vmax.xlane.f32.xlu0 %v943_v6 }
 0x398   :  { %1010 = vrot.lane.b32.xlu1 %v4827_v23, %s4686_s23 }
 0x39c   :  { %1162 = vrot.lane.b32.xlu1 %v4853_v26, %s4686_s23 }
 0x3a0   :  { %1238 = vrot.lane.b32.xlu1 %v4859_v28, %s4686_s23 }
 0x3a1   :  { %1086 = vrot.lane.b32.xlu0 %v4837_v24, %s4686_s23 }
 0x3a4   :  { %1390 = vrot.lane.b32.xlu1 %v4857_v27, %s4686_s23 }
 0x3a5   :  { %1314 = vrot.lane.b32.xlu0 %v4851_v25, %s4686_s23  ;;  %v924_v9 = vpop.xlane.xlu0 %923 }
 0x3a6   :  { %v946_v10 = vsub.f32 %v379_v47, %v924_v9 }
 0x3a8   :  { %v954_v12 = vmul.f32 1.442695, %v946_v10 }
 0x3a9   :  { %v927_v7 = vpop.xlane.xlu1 %926 }
 0x3aa   :  { %v947_v8 = vsub.f32 %v456_v50, %v927_v7 }
 0x3ac   :  { %v956_v11 = vmul.f32 1.442695, %v947_v8 }
 0x3ae   :  { %4576 = vpow2.f32 %v956_v11 }
 0x3af   :  { %4578 = vpow2.f32 %v954_v12 }
 0x3b8   :  { %v4943_v13 = vpop.eup %4576 }
 0x3b9   :  { %v973_v14 = vsel %vm307_vm4, %v4943_v13, 0.0  ;;  %v4947_v15 = vpop.eup %4578 }
 0x3ba   :  { %v970_v16 = vsel %vm307_vm4, %v4947_v15, 0.0 }
 0x3c4   :  { %974 = vadd.xlane.f32.xlu0 %v973_v14 }
 0x3c8   :  { %971 = vadd.xlane.f32.xlu1 %v970_v16 }
 0x40c   :  { %v930_v19 = vpop.xlane.xlu0 %929 }
 0x40d   :  { %v948_v20 = vsub.f32 %v533_v53, %v930_v19 }
 0x40f   :  { %v958_v22 = vmul.f32 1.442695, %v948_v20 }
 0x410   :  { %v936_v23 = vpop.xlane.xlu1 %935  ;;  %v933_v24 = vpop.xlane.xlu0 %932 }
 0x411   :  { %4580 = vpow2.f32 %v958_v22  ;;  %v950_v25 = vsub.f32 %v687_v57, %v936_v23  ;;  %v949_v26 = vsub.f32 %v610_v56, %v933_v24 }
 0x413   :  { %v962_v27 = vmul.f32 1.442695, %v950_v25  ;;  %v960_v28 = vmul.f32 1.442695, %v949_v26  ;;  %v166_v25 = vld [vmem:[%s5414_s6] sm:$0xff]  ;;  %v167_v26 = vld [vmem:[%s5414_s6 + $0x8] sm:$0xff] }
 0x414   :  { %v942_v31 = vpop.xlane.xlu1 %941  ;;  %v939_v32 = vpop.xlane.xlu0 %938 }
 0x415   :  { %4582 = vpow2.f32 %v962_v27  ;;  %v952_v33 = vsub.f32 %v841_v63, %v942_v31  ;;  %v951_v34 = vsub.f32 %v764_v62, %v939_v32  ;;  %v4486_v27 = vpack.c.bf16 %v167_v26, %v166_v25  ;;  %v169_v31 = vld [vmem:[%s5414_s6 + $0x18] sm:$0xff] }
 0x416   :  { %4584 = vpow2.f32 %v960_v28  ;;  %v168_v28 = vld [vmem:[%s5414_s6 + $0x10] sm:$0xff] }
 0x417   :  { %v966_v35 = vmul.f32 1.442695, %v952_v33  ;;  %v964_v36 = vmul.f32 1.442695, %v951_v34  ;;  %v4490_v32 = vpack.c.bf16 %v169_v31, %v168_v28 }
 0x418   :  { %v1011_v37 = vpop.permute.xlu1 %1010  ;;  %v945_v38 = vpop.xlane.xlu0 %944 }
 0x419   :  { %4586 = vpow2.f32 %v966_v35  ;;  %v953_v39 = vsub.f32 %v918_v4, %v945_v38  ;;  %4255 = vmatpush3.msra.mxu1 %v1011_v37 }
 0x41a   :  { %4588 = vpow2.f32 %v964_v36  ;;  %4264 = vmatprep.subr.mxu1 %v4680_v21 }
 0x41b   :  { %v4581_v40 = vpop.eup %4580  ;;  %v968_v41 = vmul.f32 1.442695, %v953_v39 }
 0x41c   :  { %v1087_v42 = vpop.permute.xlu0 %1086  ;;  %v976_v43 = vsel %vm307_vm4, %v4581_v40, 0.0  ;;  %v1163_v54 = vpop.permute.xlu1 %1162 }
 0x41d   :  { %4590 = vpow2.f32 %v968_v41  ;;  %977 = vadd.xlane.f32.xlu1 %v976_v43  ;;  %4260 = vmatpush3.msra.mxu0 %v1087_v42 }
 0x41e   :  { %4269 = vmatprep.subr.mxu0 %v4680_v21 }
 0x41f   :  { %v4583_v44 = vpop.eup %4582 }
 0x420   :  { %v4585_v45 = vpop.eup %4584  ;;  %v982_v46 = vsel %vm307_vm4, %v4583_v44, 0.0  ;;  %v1239_v55 = vpop.permute.xlu1 %1238 }
 0x421   :  { %983 = vadd.xlane.f32.xlu1 %v982_v46  ;;  %v979_v47 = vsel %vm307_vm4, %v4585_v45, 0.0  ;;  %v1315_v56 = vpop.permute.xlu0 %1314 }
 0x422   :  { %980 = vadd.xlane.f32.xlu0 %v979_v47 }
 0x423   :  { %v4587_v48 = vpop.eup %4586 }
 0x424   :  { %v4589_v49 = vpop.eup %4588  ;;  %v988_v50 = vsel %vm307_vm4, %v4587_v48, 0.0  ;;  %v1391_v57 = vpop.permute.xlu1 %1390 }
 0x425   :  { %989 = vadd.xlane.f32.xlu1 %v988_v50  ;;  %v985_v51 = vsel %vm307_vm4, %v4589_v49, 0.0 }
 0x426   :  { %986 = vadd.xlane.f32.xlu0 %v985_v51 }
 0x427   :  { %v4958_v52 = vpop.eup %4590 }
 0x428   :  { %v991_v53 = vsel %vm307_vm4, %v4958_v52, 0.0 }
 0x42a   :  { %992 = vadd.xlane.f32.xlu0 %v991_v53 }
 0x436   :  { %1542 = vrot.lane.b32.xlu1 %v4871_v30, %s4686_s23 }
 0x440   :  { %1466 = vrot.lane.b32.xlu0 %v4865_v29, %s4686_s23 }
 0x451   :  { %v975_v58 = vpop.xlane.xlu0 %974 }
 0x452   :  { %4592 = vrcp.f32 %v975_v58 }
 0x455   :  { %v972_v59 = vpop.xlane.xlu1 %971 }
 0x456   :  { %4594 = vrcp.f32 %v972_v59 }
 0x45c   :  { %v4593_v60 = vpop.eup %4592 }
 0x45d   :  { %v1003_v61 = vmul.f32 %v4593_v60, %v4943_v13 }
 0x45f   :  { %4262 = vmatmul.mubr.msk.f32.vlgmr.msra.gmra.mrb[14].mxu0 %vm307_vm4, %v1003_v61 }
 0x460   :  { %v4595_v62 = vpop.eup %4594  ;;  %4270 = vmatpush3.msra.mxu0 %v1239_v55  ;;  %4271 = vmatprep.mubr.msk.f32.mxu0 %vm4683_vm3, %v4680_v21 }
 0x461   :  { %v1002_v29 = vmul.f32 %v4595_v62, %v4947_v15  ;;  %4279 = vmatprep.subr.mxu0 %v4680_v21 }
 0x463   :  { %4257 = vmatmul.mubr.msk.f32.vlgmr.msra.gmra.mrb[6].mxu1 %vm307_vm4, %v1002_v29 }
 0x464   :  { %4265 = vmatpush3.msra.mxu1 %v1163_v54  ;;  %4266 = vmatprep.mubr.msk.f32.mxu1 %vm4683_vm3, %v4680_v21 }
 0x465   :  { %4274 = vmatprep.subr.mxu1 %v4680_v21 }
 0x4aa   :  { %v978_v30 = vpop.xlane.xlu1 %977 }
 0x4ab   :  { %4596 = vrcp.f32 %v978_v30 }
 0x4ae   :  { %v984_v63 = vpop.xlane.xlu1 %983 }
 0x4af   :  { %4598 = vrcp.f32 %v984_v63  ;;  %v981_v0 = vpop.xlane.xlu0 %980 }
 0x4b0   :  { %4600 = vrcp.f32 %v981_v0 }
 0x4b2   :  { %v990_v1 = vpop.xlane.xlu1 %989 }
 0x4b3   :  { %4602 = vrcp.f32 %v990_v1  ;;  %v987_v2 = vpop.xlane.xlu0 %986 }
 0x4b4   :  { %4604 = vrcp.f32 %v987_v2 }
 0x4b5   :  { %v4597_v3 = vpop.eup %4596 }
 0x4b6   :  { %v1004_v4 = vmul.f32 %v4597_v3, %v4581_v40  ;;  %v1543_v15 = vpop.permute.xlu1 %1542 }
 0x4b7   :  { %v993_v5 = vpop.xlane.xlu0 %992 }
 0x4b8   :  { %4606 = vrcp.f32 %v993_v5  ;;  %4267 = vmatmul.mubr.msk.f32.vlgmr.msra.gmra.mrb[8].mxu1 %vm307_vm4, %v1004_v4 }
 0x4b9   :  { %v4599_v6 = vpop.eup %4598  ;;  %4275 = vmatpush3.msra.mxu1 %v1315_v56  ;;  %4276 = vmatprep.mubr.msk.f32.mxu1 %vm4683_vm3, %v4680_v21 }
 0x4ba   :  { %v4601_v7 = vpop.eup %4600  ;;  %v1006_v8 = vmul.f32 %v4599_v6, %v4583_v44  ;;  %4284 = vmatprep.subr.mxu1 %v4680_v21 }
 0x4bb   :  { %v1005_v9 = vmul.f32 %v4601_v7, %v4585_v45  ;;  %v1467_v10 = vpop.permute.xlu0 %1466 }
 0x4bc   :  { %4277 = vmatmul.mubr.msk.f32.vlgmr.msra.gmra.mrb[10].mxu1 %vm307_vm4, %v1006_v8 }
 0x4bd   :  { %v4603_v11 = vpop.eup %4602  ;;  %4272 = vmatmul.mubr.msk.f32.vlgmr.msra.gmra.mrb[16].mxu0 %vm307_vm4, %v1005_v9  ;;  %4285 = vmatpush3.msra.mxu1 %v1467_v10  ;;  %v174_v9 = vld [vmem:[%s5418_s10 + $0x8] sm:$0xff] }
 0x4be   :  { %v4605_v12 = vpop.eup %4604  ;;  %v1008_v13 = vmul.f32 %v4603_v11, %v4587_v48  ;;  %4280 = vmatpush3.msra.mxu0 %v1391_v57  ;;  %4281 = vmatprep.mubr.msk.f32.mxu0 %vm4683_vm3, %v4680_v21  ;;  %v3987_v57 = vld [vmem:[%s5415_s7] ss:$0 sm:$0xff]  ;;  %v175_v11 = vld [vmem:[%s5418_s10 + $0x10] sm:$0xff] }
 0x4bf   :  { %v1007_v14 = vmul.f32 %v4605_v12, %v4589_v49  ;;  %4286 = vmatprep.mubr.msk.f32.mxu1 %vm4683_vm3, %v4680_v21  ;;  %4289 = vmatprep.subr.mxu0 %v4680_v21  ;;  %v176_v12 = vld [vmem:[%s5418_s10 + $0x18] sm:$0xff] }
 0x4c0   :  { %4287 = vmatmul.mubr.msk.f32.vlgmr.msra.gmra.mrb[12].mxu1 %vm307_vm4, %v1008_v13  ;;  %4487 = vmatprep.subr.bf16.mxu1 %v4486_v27  ;;  %v4498_v13 = vpack.c.bf16 %v176_v12, %v175_v11 }
 0x4c1   :  { %4282 = vmatmul.mubr.msk.f32.vlgmr.msra.gmra.mrb[18].mxu0 %vm307_vm4, %v1007_v14  ;;  %4489 = vmatpush3.bf16.msra.mxu1 %v4486_v27  ;;  %v178_v14 = vld [vmem:[%s5420_s12] sm:$0xff] }
 0x4c2   :  { %v4607_v16 = vpop.eup %4606  ;;  %4290 = vmatpush3.msra.mxu0 %v1543_v15  ;;  %4291 = vmatprep.mubr.msk.f32.mxu0 %vm4683_vm3, %v4680_v21  ;;  %v179_v15 = vld [vmem:[%s5420_s12 + $0x8] sm:$0xff] }
 0x4c3   :  { %v1009_v19 = vmul.f32 %v4607_v16, %v4958_v52  ;;  %4491 = vmatprep.subr.bf16.mxu1 %v4490_v32  ;;  %v180_v16 = vld [vmem:[%s5420_s12 + $0x10] sm:$0xff] }
 0x4c5   :  { %4292 = vmatmul.mubr.msk.f32.vlgmr.msra.gmra.mrb[20].mxu0 %vm307_vm4, %v1009_v19  ;;  %4493 = vmatpush3.bf16.msra.mxu1 %v4490_v32  ;;  %v4502_v19 = vpack.c.bf16 %v179_v15, %v178_v14 }
 0x4c7   :  { %4503 = vmatprep.subr.bf16.mxu1 %v4502_v19 }
 0x532   :  { %v1158_v20 = vpop.f32.mrb[14].mxu0 }
 0x533   :  { %v4263_v22 = vpop.f32.mrb[15].mxu0 }
 0x536   :  { %v1082_v23 = vpop.f32.mrb[6].mxu1 }
 0x537   :  { %v4258_v24 = vpop.f32.mrb[7].mxu1 }
 0x538   :  { %v183_v24 = vld [vmem:[%s5420_s12 + $0x28] sm:$0xff] }
 0x58b   :  { %v1234_v33 = vpop.f32.mrb[8].mxu1 }
 0x58c   :  { %v4268_v34 = vpop.f32.mrb[9].mxu1  ;;  %1620 = vrot.lane.b32.xlu0 %v1234_v33, %s4687_s19 }
 0x58f   :  { %v1386_v35 = vpop.f32.mrb[10].mxu1 }
 0x590   :  { %v1310_v36 = vpop.f32.mrb[16].mxu0  ;;  %1628 = vrot.lane.b32.xlu0 %v1386_v35, %s5430_s1  ;;  %v4278_v37 = vpop.f32.mrb[11].mxu1  ;;  %v3990_v35 = vld [vmem:[%s5416_s8] ss:$0 sm:$0xff] }
 0x591   :  { %1622 = vrot.lane.b32.xlu1 %v1310_v36, %s4687_s19  ;;  %v4273_v38 = vpop.f32.mrb[17].mxu0  ;;  %v3991_v37 = vld [vmem:[%s5417_s9] ss:$0 sm:$0xff] }
 0x593   :  { %v1538_v39 = vpop.f32.mrb[12].mxu1 }
 0x594   :  { %v1462_v40 = vpop.f32.mrb[18].mxu0  ;;  %1636 = vrot.lane.b32.xlu0 %v1538_v39, %s5428_s20  ;;  %v4288_v41 = vpop.f32.mrb[13].mxu1 }
 0x595   :  { %1630 = vrot.lane.b32.xlu1 %v1462_v40, %s5430_s1  ;;  %v4283_v42 = vpop.f32.mrb[19].mxu0 }
 0x598   :  { %v1614_v43 = vpop.f32.mrb[20].mxu0 }
 0x599   :  { %1638 = vrot.lane.b32.xlu1 %v1614_v43, %s5428_s20  ;;  %v4293_v44 = vpop.f32.mrb[21].mxu0 }
 0x59a   :  { %v184_v44 = vld [vmem:[%s5420_s12 + $0x30] sm:$0xff] }
 0x5fe   :  { %v1621_v45 = vpop.permute.xlu0 %1620 }
 0x5ff   :  { %v1642_v48 = vsel %vm307_vm4, %v1082_v23, %v1621_v45  ;;  %v182_v23 = vld [vmem:[%s5420_s12 + $0x20] sm:$0xff]  ;;  %v185_v45 = vld [vmem:[%s5420_s12 + $0x38] sm:$0xff] }
 0x600   :  { %v4510_v25 = vpack.c.bf16 %v183_v24, %v182_v23 }
 0x602   :  { %v1629_v46 = vpop.permute.xlu0 %1628 }
 0x603   :  { %v1623_v47 = vpop.permute.xlu1 %1622  ;;  %v1645_v49 = vsel %vm1644_vm5, %v1642_v48, %v1629_v46  ;;  %v4514_v46 = vpack.c.bf16 %v185_v45, %v184_v44 }
 0x604   :  { %v1643_v53 = vsel %vm307_vm4, %v1158_v20, %v1623_v47  ;;  %v181_v20 = vld [vmem:[%s5420_s12 + $0x18] sm:$0xff]  ;;  %v3992_v47 = vld [vmem:[%s5419_s11] ss:$0 sm:$0xff] }
 0x605   :  { %v4506_v22 = vpack.c.bf16 %v181_v20, %v180_v16  ;;  %v3998_v20 = vld [vmem:[%s5422_s14] ss:$0 sm:$0xff] }
 0x606   :  { %v1637_v50 = vpop.permute.xlu0 %1636 }
 0x607   :  { %v1648_v51 = vsel %vm1647_vm6, %v1645_v49, %v1637_v50  ;;  %v1631_v52 = vpop.permute.xlu1 %1630 }
 0x608   :  { %4302 = vmatprep.mubr.msk.f32.mxu1 %vm195_vm2, %v1648_v51  ;;  %v1646_v54 = vsel %vm1644_vm5, %v1643_v53, %v1631_v52 }
 0x60b   :  { %v1639_v55 = vpop.permute.xlu1 %1638 }
 0x60c   :  { %v1649_v56 = vsel %vm1647_vm6, %v1646_v54, %v1639_v55  ;;  %v3995_v54 = vld [vmem:[%s5421_s13] ss:$0 sm:$0xff] }
 0x60d   :  { %4303 = vmatmul.mubr.msk.f32.vlgmr.msra.gmra.mrb[14].mxu1 %vm195_vm2, %v1649_v56 }
 0x60e   :  { %4505 = vmatpush3.bf16.msra.mxu1 %v4502_v19 }
 0x60f   :  { %4507 = vmatprep.subr.bf16.mxu1 %v4506_v22 }
 0x612   :  { %4509 = vmatpush3.bf16.msra.mxu1 %v4506_v22 }
 0x613   :  { %4511 = vmatprep.subr.bf16.mxu1 %v4510_v25 }
 0x616   :  { %4513 = vmatpush3.bf16.msra.mxu1 %v4510_v25  ;;  %v3999_v25 = vld [vmem:[%s5423_s15] ss:$0 sm:$0xff] }
 0x617   :  { %4515 = vmatprep.subr.bf16.mxu1 %v4514_v46 }
 0x61a   :  { %4517 = vmatpush3.bf16.msra.mxu1 %v4514_v46 }
 0x61b   :  { %4356 = vmatprep.subr.mxu1 %v4680_v21 }
 0x6e0   :  { %v4304_v58 = vpop.f32.mrb[14].mxu1 }
 0x6e1   :  { %v1734_v59 = vadd.f32 %v4304_v58, %v3987_v57  ;;  %v1728_v60 = vpop.f32.mrb[15].mxu1 }
 0x6e2   :  { %v1729_v61 = vadd.f32 %v3987_v57, %v1728_v60 }
 0x6e3   :  { %v1738_v62 = vadd.f32 %v1734_v59, %v4816_v18 }
 0x6e4   :  { %v1737_v29 = vadd.f32 %v1729_v61, %v4814_v17  ;;  %v173_v17 = vld [vmem:[%s5418_s10] sm:$0xff] }
 0x6e5   :  { %v1742_v30 = vsel %vm195_vm2, %v1738_v62, 0.0  ;;  %v4494_v10 = vpack.c.bf16 %v174_v9, %v173_v17  ;;  %v4002_v17 = vld [vmem:[%s5412_s4 + $0x30] sm:$0xff]  ;;  %v4003_v9 = vld [vmem:[%s5412_s4 + $0x38] sm:$0xff] }
 0x6e6   :  { %1743 = vadd.xlane.f32.xlu1 %v1742_v30  ;;  %v1739_v63 = vsel %vm195_vm2, %v1737_v29, 0.0 }
 0x6e7   :  { %1740 = vadd.xlane.f32.xlu0 %v1739_v63  ;;  %4495 = vmatprep.subr.bf16.mxu0 %v4494_v10 }
 0x6e8   :  { %4497 = vmatpush3.bf16.msra.mxu0 %v4494_v10  ;;  %v4522_v10 = vpack.c.bf16 %v4003_v9, %v4002_v17 }
 0x6e9   :  { %4499 = vmatprep.subr.bf16.mxu0 %v4498_v13 }
 0x6ec   :  { %4501 = vmatpush3.bf16.msra.mxu0 %v4498_v13 }
 0x773   :  { %v1744_v0 = vpop.xlane.xlu1 %1743 }
 0x774   :  { %v1747_v1 = vmul.f32 0.03125, %v1744_v0  ;;  %v1741_v2 = vpop.xlane.xlu0 %1740 }
 0x775   :  { %v1746_v3 = vmul.f32 0.03125, %v1741_v2 }
 0x776   :  { %v1749_v4 = vsub.f32 %v1738_v62, %v1747_v1 }
 0x777   :  { %v1748_v5 = vsub.f32 %v1737_v29, %v1746_v3 }
 0x778   :  { %v1751_v8 = vmul.f32 %v1749_v4, %v1749_v4 }
 0x779   :  { %v1750_v6 = vmul.f32 %v1748_v5, %v1748_v5 }
 0x77a   :  { %v1755_v18 = vsel %vm195_vm2, %v1751_v8, 0.0  ;;  %v4001_v8 = vld [vmem:[%s5412_s4 + $0x28] sm:$0xff] }
 0x77b   :  { %v1752_v7 = vsel %vm195_vm2, %v1750_v6, 0.0 }
 0x77c   :  { %1753 = vadd.xlane.f32.xlu0 %v1752_v7  ;;  %v4000_v7 = vld [vmem:[%s5412_s4 + $0x20] sm:$0xff] }
 0x780   :  { %1756 = vadd.xlane.f32.xlu0 %v1755_v18  ;;  %v4518_v18 = vpack.c.bf16 %v4001_v8, %v4000_v7 }
 0x782   :  { %4519 = vmatprep.subr.bf16.mxu0 %v4518_v18 }
 0x809   :  { %v1754_v26 = vpop.xlane.xlu0 %1753 }
 0x80a   :  { %v1758_v27 = vmul.f32 0.03125, %v1754_v26 }
 0x80c   :  { %v1760_v28 = vadd.f32 1e-05, %v1758_v27 }
 0x80d   :  { %v1757_v31 = vpop.xlane.xlu0 %1756 }
 0x80e   :  { %4608 = vrsqrt.f32 %v1760_v28  ;;  %v1759_v32 = vmul.f32 0.03125, %v1757_v31 }
 0x810   :  { %v1761_v33 = vadd.f32 1e-05, %v1759_v32  ;;  %v4028_v32 = vld [vmem:[%s5413_s5 + $0x1] ss:$0 sm:$0xff] }
 0x812   :  { %4610 = vrsqrt.f32 %v1761_v33 }
 0x818   :  { %v4609_v34 = vpop.eup %4608 }
 0x819   :  { %v1764_v36 = vmul.f32 %v4609_v34, %v1748_v5 }
 0x81b   :  { %v1772_v38 = vmul.f32 %v3990_v35, %v1764_v36 }
 0x81c   :  { %v4611_v39 = vpop.eup %4610 }
 0x81d   :  { %v1765_v40 = vmul.f32 %v4611_v39, %v1749_v4  ;;  %v1780_v41 = vadd.f32 %v3991_v37, %v1772_v38 }
 0x81f   :  { %v1773_v42 = vmul.f32 %v3990_v35, %v1765_v40  ;;  %4313 = vmatprep.mubr.msk.f32.mxu0 %vm195_vm2, %v1780_v41 }
 0x821   :  { %v1781_v43 = vadd.f32 %v3991_v37, %v1773_v42 }
 0x823   :  { %4314 = vmatmul.mubr.msk.f32.vlgmr.msra.gmra.mrb[22].mxu0 %vm195_vm2, %v1781_v43 }
 0x824   :  { %4521 = vmatpush3.bf16.msra.mxu0 %v4518_v18 }
 0x825   :  { %4523 = vmatprep.subr.bf16.mxu0 %v4522_v10 }
 0x828   :  { %4525 = vmatpush3.bf16.msra.mxu0 %v4522_v10 }
 0x829   :  { %4346 = vmatprep.subr.mxu0 %v4680_v21 }
 0x8f6   :  { %v4315_v48 = vpop.f32.mrb[22].mxu0 }
 0x8f7   :  { %v1866_v49 = vadd.f32 %v4315_v48, %v3992_v47  ;;  %v1860_v50 = vpop.f32.mrb[23].mxu0 }
 0x8f8   :  { %v1861_v51 = vadd.f32 %v3992_v47, %v1860_v50 }
 0x8f9   :  { %v1870_v53 = vmax.f32 %v1866_v49, 0.0 }
 0x8fa   :  { %v1869_v52 = vmax.f32 %v1861_v51, 0.0 }
 0x8fc   :  { %4332 = vmatprep.mubr.msk.f32.mxu1 %vm1877_vm7, %v1869_v52 }
 0x8fd   :  { %4333 = vmatmul.mubr.msk.f32.vlgmr.msra.gmra.mrb[16].mxu1 %vm1877_vm7, %v1870_v53 }
 0x8fe   :  { %4358 = vmatprep.mubr.msk.f32.mxu1 %vm4683_vm3, %v4680_v21 }
 0x9d0   :  { %v4334_v55 = vpop.f32.mrb[16].mxu1 }
 0x9d1   :  { %v1956_v56 = vadd.f32 %v4334_v55, %v3995_v54  ;;  %v1950_v57 = vpop.f32.mrb[17].mxu1 }
 0x9d2   :  { %v1951_v58 = vadd.f32 %v3995_v54, %v1950_v57 }
 0x9d3   :  { %v1960_v59 = vadd.f32 %v1956_v56, %v1781_v43 }
 0x9d4   :  { %v1959_v60 = vadd.f32 %v1951_v58, %v1780_v41 }
 0x9d5   :  { %v1964_v61 = vsel %vm195_vm2, %v1960_v59, 0.0 }
 0x9d6   :  { %1965 = vadd.xlane.f32.xlu0 %v1964_v61  ;;  %v1961_v62 = vsel %vm195_vm2, %v1959_v60, 0.0 }
 0x9d7   :  { %1962 = vadd.xlane.f32.xlu1 %v1961_v62 }
 0xa63   :  { %v1966_v29 = vpop.xlane.xlu0 %1965 }
 0xa64   :  { %v1968_v30 = vmul.f32 0.03125, %v1966_v29  ;;  %v1963_v63 = vpop.xlane.xlu1 %1962 }
 0xa65   :  { %v1967_v0 = vmul.f32 0.03125, %v1963_v63 }
 0xa66   :  { %v1970_v1 = vsub.f32 %v1960_v59, %v1968_v30 }
 0xa67   :  { %v1969_v2 = vsub.f32 %v1959_v60, %v1967_v0 }
 0xa68   :  { %v1972_v3 = vmul.f32 %v1970_v1, %v1970_v1 }
 0xa69   :  { %v1971_v4 = vmul.f32 %v1969_v2, %v1969_v2 }
 0xa6a   :  { %v1976_v5 = vsel %vm195_vm2, %v1972_v3, 0.0 }
 0xa6b   :  { %1977 = vadd.xlane.f32.xlu0 %v1976_v5  ;;  %v1973_v6 = vsel %vm195_vm2, %v1971_v4, 0.0 }
 0xa6c   :  { %1974 = vadd.xlane.f32.xlu1 %v1973_v6 }
 0xaf8   :  { %v1978_v11 = vpop.xlane.xlu0 %1977 }
 0xaf9   :  { %v1980_v12 = vmul.f32 0.03125, %v1978_v11  ;;  %v1975_v13 = vpop.xlane.xlu1 %1974 }
 0xafa   :  { %v1979_v14 = vmul.f32 0.03125, %v1975_v13 }
 0xafb   :  { %v1982_v15 = vadd.f32 1e-05, %v1980_v12 }
 0xafc   :  { %v1981_v16 = vadd.f32 1e-05, %v1979_v14 }
 0xafd   :  { %4612 = vrsqrt.f32 %v1982_v15 }
 0xafe   :  { %4614 = vrsqrt.f32 %v1981_v16 }
 0xb07   :  { %v4613_v19 = vpop.eup %4612 }
 0xb08   :  { %v4615_v22 = vpop.eup %4614  ;;  %v1986_v23 = vmul.f32 %v4613_v19, %v1970_v1 }
 0xb09   :  { %v1985_v24 = vmul.f32 %v4615_v22, %v1969_v2 }
 0xb0a   :  { %v1994_v26 = vmul.f32 %v3998_v20, %v1986_v23 }
 0xb0b   :  { %v1993_v27 = vmul.f32 %v3998_v20, %v1985_v24 }
 0xb0c   :  { %v5108_v31 = vadd.f32 %v3999_v25, %v1994_v26 }
 0xb0d   :  { %v5106_v28 = vadd.f32 %v3999_v25, %v1993_v27 }
 0xb0f   :  { %4343 = vmatprep.mubr.msk.f32.mxu0 %vm195_vm2, %v5106_v28 }
 0xb10   :  { %4344 = vmatmul.mubr.msk.f32.vlgmr.msra.gmra.mrb[24].mxu0 %vm195_vm2, %v5108_v31 }
 0xb11   :  { %4348 = vmatprep.mubr.msk.f32.mxu0 %vm4683_vm3, %v4680_v21 }
 0xbe3   :  { %v4345_v33 = vpop.f32.mrb[24].mxu0 }
 0xbe4   :  { %v5119_v34 = vadd.f32 %v4345_v33, %v4028_v32  ;;  %v2121_v35 = vpop.f32.mrb[25].mxu0 }
 0xbe5   :  { %v5121_v36 = vadd.f32 %v4028_v32, %v2121_v35 }
 0xbe6   :  { %2134 = vrot.lane.b32.xlu0 %v5119_v34, %s4682_s21  ;;  %v2151_v46 = vmul.f32 0.35355338, %v5119_v34 }
 0xbe7   :  { %2132 = vrot.lane.b32.xlu1 %v5121_v36, %s4682_s21  ;;  %v2150_v43 = vmul.f32 0.35355338, %v5121_v36 }
 0xbea   :  { %2144 = vrot.lane.b32.xlu0 %v5121_v36, %s4684_s22 }
 0xbeb   :  { %2138 = vrot.lane.b32.xlu1 %v5121_v36, %s4681_s3 }
 0xbee   :  { %2158 = vrot.lane.b32.xlu0 %v5121_v36, %s4685_s2 }
 0xbef   :  { %2140 = vrot.lane.b32.xlu1 %v5119_v34, %s4681_s3 }
 0xbf3   :  { %2146 = vrot.lane.b32.xlu1 %v5119_v34, %s4684_s22 }
 0xbf7   :  { %2235 = vrot.lane.b32.xlu1 %v5119_v34, %s4685_s2 }
 0xc58   :  { %v5139_v37 = vpop.permute.xlu0 %2134 }
 0xc59   :  { %2389 = vrot.lane.b32.xlu1 %v5139_v37, %s4685_s2  ;;  %v5143_v38 = vpop.permute.xlu1 %2132  ;;  %v2153_v49 = vmul.f32 0.35355338, %v5139_v37 }
 0xc5a   :  { %2312 = vrot.lane.b32.xlu0 %v5143_v38, %s4685_s2  ;;  %v2152_v50 = vmul.f32 0.35355338, %v5143_v38 }
 0xc5c   :  { %v5147_v39 = vpop.permute.xlu0 %2144 }
 0xc5d   :  { %v5149_v40 = vpop.permute.xlu1 %2138  ;;  %v2156_v55 = vmul.f32 0.35355338, %v5147_v39 }
 0xc5e   :  { %2466 = vrot.lane.b32.xlu0 %v5149_v40, %s4685_s2  ;;  %v2154_v52 = vmul.f32 0.35355338, %v5149_v40 }
 0xc60   :  { %v2159_v41 = vpop.permute.xlu0 %2158 }
 0xc61   :  { %4347 = vmatpush3.xpose.msk.msra.mxu0 %vm307_vm4, %v2159_v41  ;;  %v5154_v42 = vpop.permute.xlu1 %2140 }
 0xc62   :  { %2620 = vrot.lane.b32.xlu0 %v5147_v39, %s4685_s2  ;;  %2543 = vrot.lane.b32.xlu1 %v5154_v42, %s4685_s2  ;;  %v2155_v56 = vmul.f32 0.35355338, %v5154_v42 }
 0xc63   :  { %4351 = vmatprep.subr.mxu0 %v4680_v21 }
 0xc64   :  { %4349 = vmatmul.mubr.msk.f32.vlgmr.msra.gmra.mrb[26].mxu0 %vm307_vm4, %v2150_v43 }
 0xc65   :  { %v5163_v44 = vpop.permute.xlu1 %2146  ;;  %4353 = vmatprep.mubr.msk.f32.mxu0 %vm4683_vm3, %v4680_v21 }
 0xc66   :  { %2697 = vrot.lane.b32.xlu1 %v5163_v44, %s4685_s2  ;;  %v2157_v58 = vmul.f32 0.35355338, %v5163_v44 }
 0xc69   :  { %v2236_v45 = vpop.permute.xlu1 %2235 }
 0xc6a   :  { %4352 = vmatpush3.xpose.msk.msra.mxu0 %vm307_vm4, %v2236_v45 }
 0xc6b   :  { %4361 = vmatprep.subr.mxu0 %v4680_v21 }
 0xc6d   :  { %4354 = vmatmul.mubr.msk.f32.vlgmr.msra.gmra.mrb[28].mxu0 %vm307_vm4, %v2151_v46 }
 0xc6e   :  { %4363 = vmatprep.mubr.msk.f32.mxu0 %vm4683_vm3, %v4680_v21 }
 0xccb   :  { %v2390_v47 = vpop.permute.xlu1 %2389 }
 0xccc   :  { %v2313_v48 = vpop.permute.xlu0 %2312  ;;  %4362 = vmatpush3.xpose.msk.msra.mxu0 %vm307_vm4, %v2390_v47 }
 0xccd   :  { %4357 = vmatpush3.xpose.msk.msra.mxu1 %vm307_vm4, %v2313_v48  ;;  %4371 = vmatprep.subr.mxu0 %v4680_v21 }
 0xcce   :  { %4366 = vmatprep.subr.mxu1 %v4680_v21 }
 0xccf   :  { %4364 = vmatmul.mubr.msk.f32.vlgmr.msra.gmra.mrb[30].mxu0 %vm307_vm4, %v2153_v49 }
 0xcd0   :  { %4359 = vmatmul.mubr.msk.f32.vlgmr.msra.gmra.mrb[18].mxu1 %vm307_vm4, %v2152_v50  ;;  %v2467_v51 = vpop.permute.xlu0 %2466  ;;  %4373 = vmatprep.mubr.msk.f32.mxu0 %vm4683_vm3, %v4680_v21 }
 0xcd1   :  { %4367 = vmatpush3.xpose.msk.msra.mxu1 %vm307_vm4, %v2467_v51  ;;  %4368 = vmatprep.mubr.msk.f32.mxu1 %vm4683_vm3, %v4680_v21 }
 0xcd2   :  { %4376 = vmatprep.subr.mxu1 %v4680_v21 }
 0xcd4   :  { %4369 = vmatmul.mubr.msk.f32.vlgmr.msra.gmra.mrb[20].mxu1 %vm307_vm4, %v2154_v52  ;;  %v2621_v53 = vpop.permute.xlu0 %2620  ;;  %v2544_v54 = vpop.permute.xlu1 %2543 }
 0xcd5   :  { %4372 = vmatpush3.xpose.msk.msra.mxu0 %vm307_vm4, %v2544_v54  ;;  %4377 = vmatpush3.xpose.msk.msra.mxu1 %vm307_vm4, %v2621_v53 }
 0xcd6   :  { %4378 = vmatprep.mubr.msk.f32.mxu1 %vm4683_vm3, %v4680_v21  ;;  %4381 = vmatprep.subr.mxu0 %v4680_v21 }
 0xcd7   :  { %4386 = vmatprep.subr.mxu1 %v4680_v21 }
 0xcd8   :  { %4379 = vmatmul.mubr.msk.f32.vlgmr.msra.gmra.mrb[22].mxu1 %vm307_vm4, %v2156_v55  ;;  %v2698_v57 = vpop.permute.xlu1 %2697  ;;  %4374 = vmatmul.mubr.msk.f32.vlgmr.msra.gmra.mrb[32].mxu0 %vm307_vm4, %v2155_v56 }
 0xcd9   :  { %4382 = vmatpush3.xpose.msk.msra.mxu0 %vm307_vm4, %v2698_v57  ;;  %4383 = vmatprep.mubr.msk.f32.mxu0 %vm4683_vm3, %v4680_v21 }
 0xcda   :  { %4391 = vmatprep.subr.mxu0 %v4680_v21  ;;  %4388 = vmatprep.mubr.msk.f32.mxu1 %vm4683_vm3, %v4680_v21 }
 0xcdc   :  { %4384 = vmatmul.mubr.msk.f32.vlgmr.msra.gmra.mrb[34].mxu0 %vm307_vm4, %v2157_v58 }
 0xcdd   :  { %4393 = vmatprep.mubr.msk.f32.mxu0 %vm4683_vm3, %v4680_v21 }
 0xd37   :  { %v2231_v59 = vpop.f32.mrb[26].mxu0 }
 0xd38   :  { %v4350_v60 = vpop.f32.mrb[27].mxu0  ;;  %v2774_v61 = vsel %vm307_vm4, %v2231_v59, -inf }
 0xd39   :  { %2775 = vmax.xlane.f32.xlu0 %v2774_v61 }
 0xd40   :  { %v2308_v62 = vpop.f32.mrb[28].mxu0 }
 0xd41   :  { %v4355_v29 = vpop.f32.mrb[29].mxu0  ;;  %v2777_v30 = vsel %vm307_vm4, %v2308_v62, -inf }
 0xd42   :  { %2778 = vmax.xlane.f32.xlu1 %v2777_v30 }
 0xda2   :  { %v2462_v63 = vpop.f32.mrb[30].mxu0 }
 0xda3   :  { %v2385_v0 = vpop.f32.mrb[18].mxu1  ;;  %v4365_v1 = vpop.f32.mrb[31].mxu0  ;;  %v2783_v7 = vsel %vm307_vm4, %v2462_v63, -inf }
 0xda4   :  { %v4360_v2 = vpop.f32.mrb[19].mxu1  ;;  %v2780_v3 = vsel %vm307_vm4, %v2385_v0, -inf }
 0xda5   :  { %2781 = vmax.xlane.f32.xlu0 %v2780_v3 }
 0xda7   :  { %v2539_v4 = vpop.f32.mrb[20].mxu1 }
 0xda8   :  { %v4370_v5 = vpop.f32.mrb[21].mxu1  ;;  %v2786_v6 = vsel %vm307_vm4, %v2539_v4, -inf }
 0xda9   :  { %2787 = vmax.xlane.f32.xlu1 %v2786_v6  ;;  %2784 = vmax.xlane.f32.xlu0 %v2783_v7 }
 0xdab   :  { %v2616_v8 = vpop.f32.mrb[32].mxu0  ;;  %v2693_v18 = vpop.f32.mrb[22].mxu1 }
 0xdac   :  { %v4375_v17 = vpop.f32.mrb[33].mxu0  ;;  %v4380_v9 = vpop.f32.mrb[23].mxu1  ;;  %v2792_v10 = vsel %vm307_vm4, %v2693_v18, -inf  ;;  %v2789_v11 = vsel %vm307_vm4, %v2616_v8, -inf }
 0xdad   :  { %2793 = vmax.xlane.f32.xlu1 %v2792_v10  ;;  %2790 = vmax.xlane.f32.xlu0 %v2789_v11 }
 0xdaf   :  { %v2770_v12 = vpop.f32.mrb[34].mxu0 }
 0xdb0   :  { %v4385_v13 = vpop.f32.mrb[35].mxu0  ;;  %v2795_v14 = vsel %vm307_vm4, %v2770_v12, -inf }
 0xdb1   :  { %2796 = vmax.xlane.f32.xlu0 %v2795_v14 }
 0xdbe   :  { %2862 = vrot.lane.b32.xlu1 %v5121_v36, %s4686_s23 }
 0xdc2   :  { %3014 = vrot.lane.b32.xlu1 %v5143_v38, %s4686_s23 }
 0xdc6   :  { %3090 = vrot.lane.b32.xlu1 %v5139_v37, %s4686_s23  ;;  %v2776_v19 = vpop.xlane.xlu0 %2775 }
 0xdc7   :  { %2938 = vrot.lane.b32.xlu0 %v5119_v34, %s4686_s23  ;;  %v2798_v20 = vsub.f32 %v2231_v59, %v2776_v19 }
 0xdc9   :  { %v2806_v23 = vmul.f32 1.442695, %v2798_v20 }
 0xdca   :  { %3242 = vrot.lane.b32.xlu1 %v5154_v42, %s4686_s23 }
 0xdcb   :  { %3166 = vrot.lane.b32.xlu0 %v5149_v40, %s4686_s23 }
 0xdcf   :  { %v2779_v15 = vpop.xlane.xlu1 %2778 }
 0xdd0   :  { %v2799_v16 = vsub.f32 %v2308_v62, %v2779_v15 }
 0xdd2   :  { %v2808_v22 = vmul.f32 1.442695, %v2799_v16 }
 0xdd4   :  { %4616 = vpow2.f32 %v2808_v22 }
 0xdd5   :  { %4618 = vpow2.f32 %v2806_v23 }
 0xdde   :  { %v5231_v24 = vpop.eup %4616 }
 0xddf   :  { %v2825_v25 = vsel %vm307_vm4, %v5231_v24, 0.0  ;;  %v5235_v26 = vpop.eup %4618 }
 0xde0   :  { %v2822_v27 = vsel %vm307_vm4, %v5235_v26, 0.0 }
 0xdea   :  { %2826 = vadd.xlane.f32.xlu0 %v2825_v25 }
 0xdee   :  { %2823 = vadd.xlane.f32.xlu1 %v2822_v27 }
 0xe32   :  { %v2782_v32 = vpop.xlane.xlu0 %2781 }
 0xe33   :  { %v2800_v33 = vsub.f32 %v2385_v0, %v2782_v32 }
 0xe35   :  { %v2810_v34 = vmul.f32 1.442695, %v2800_v33 }
 0xe36   :  { %v2788_v35 = vpop.xlane.xlu1 %2787  ;;  %v2785_v36 = vpop.xlane.xlu0 %2784 }
 0xe37   :  { %4620 = vpow2.f32 %v2810_v34  ;;  %v2802_v37 = vsub.f32 %v2539_v4, %v2788_v35  ;;  %v2801_v38 = vsub.f32 %v2462_v63, %v2785_v36 }
 0xe39   :  { %v2814_v40 = vmul.f32 1.442695, %v2802_v37  ;;  %v2812_v41 = vmul.f32 1.442695, %v2801_v38  ;;  %v4005_v37 = vld [vmem:[%s5414_s6 + $0x20] sm:$0xff]  ;;  %v4006_v38 = vld [vmem:[%s5414_s6 + $0x28] sm:$0xff] }
 0xe3a   :  { %v2794_v42 = vpop.xlane.xlu1 %2793  ;;  %v2791_v43 = vpop.xlane.xlu0 %2790 }
 0xe3b   :  { %4622 = vpow2.f32 %v2814_v40  ;;  %v2804_v45 = vsub.f32 %v2693_v18, %v2794_v42  ;;  %v2803_v46 = vsub.f32 %v2616_v8, %v2791_v43  ;;  %v4526_v40 = vpack.c.bf16 %v4006_v38, %v4005_v37  ;;  %v4008_v42 = vld [vmem:[%s5414_s6 + $0x38] sm:$0xff] }
 0xe3c   :  { %4624 = vpow2.f32 %v2812_v41  ;;  %v4007_v41 = vld [vmem:[%s5414_s6 + $0x30] sm:$0xff] }
 0xe3d   :  { %v2818_v47 = vmul.f32 1.442695, %v2804_v45  ;;  %v2816_v48 = vmul.f32 1.442695, %v2803_v46  ;;  %v4530_v43 = vpack.c.bf16 %v4008_v42, %v4007_v41 }
 0xe3e   :  { %v2863_v49 = vpop.permute.xlu1 %2862  ;;  %v2797_v50 = vpop.xlane.xlu0 %2796 }
 0xe3f   :  { %4626 = vpow2.f32 %v2818_v47  ;;  %v2805_v51 = vsub.f32 %v2770_v12, %v2797_v50  ;;  %4387 = vmatpush3.msra.mxu1 %v2863_v49 }
 0xe40   :  { %4628 = vpow2.f32 %v2816_v48  ;;  %4396 = vmatprep.subr.mxu1 %v4680_v21 }
 0xe41   :  { %v4621_v52 = vpop.eup %4620  ;;  %v2820_v53 = vmul.f32 1.442695, %v2805_v51 }
 0xe42   :  { %v2939_v54 = vpop.permute.xlu0 %2938  ;;  %v2828_v55 = vsel %vm307_vm4, %v4621_v52, 0.0  ;;  %v3015_v0 = vpop.permute.xlu1 %3014 }
 0xe43   :  { %4630 = vpow2.f32 %v2820_v53  ;;  %2829 = vadd.xlane.f32.xlu1 %v2828_v55  ;;  %4392 = vmatpush3.msra.mxu0 %v2939_v54 }
 0xe44   :  { %4401 = vmatprep.subr.mxu0 %v4680_v21 }
 0xe45   :  { %v4623_v56 = vpop.eup %4622 }
 0xe46   :  { %v4625_v57 = vpop.eup %4624  ;;  %v2834_v58 = vsel %vm307_vm4, %v4623_v56, 0.0  ;;  %v3091_v1 = vpop.permute.xlu1 %3090 }
 0xe47   :  { %2835 = vadd.xlane.f32.xlu1 %v2834_v58  ;;  %v2831_v59 = vsel %vm307_vm4, %v4625_v57, 0.0  ;;  %v3167_v2 = vpop.permute.xlu0 %3166 }
 0xe48   :  { %2832 = vadd.xlane.f32.xlu0 %v2831_v59 }
 0xe49   :  { %v4627_v60 = vpop.eup %4626 }
 0xe4a   :  { %v4629_v61 = vpop.eup %4628  ;;  %v2840_v62 = vsel %vm307_vm4, %v4627_v60, 0.0  ;;  %v3243_v3 = vpop.permute.xlu1 %3242 }
 0xe4b   :  { %2841 = vadd.xlane.f32.xlu1 %v2840_v62  ;;  %v2837_v29 = vsel %vm307_vm4, %v4629_v61, 0.0 }
 0xe4c   :  { %2838 = vadd.xlane.f32.xlu0 %v2837_v29 }
 0xe4d   :  { %v5246_v30 = vpop.eup %4630 }
 0xe4e   :  { %v2843_v63 = vsel %vm307_vm4, %v5246_v30, 0.0 }
 0xe50   :  { %2844 = vadd.xlane.f32.xlu0 %v2843_v63 }
 0xe5c   :  { %3394 = vrot.lane.b32.xlu1 %v5163_v44, %s4686_s23 }
 0xe66   :  { %3318 = vrot.lane.b32.xlu0 %v5147_v39, %s4686_s23 }
 0xe77   :  { %v2827_v4 = vpop.xlane.xlu0 %2826 }
 0xe78   :  { %4632 = vrcp.f32 %v2827_v4 }
 0xe7b   :  { %v2824_v5 = vpop.xlane.xlu1 %2823 }
 0xe7c   :  { %4634 = vrcp.f32 %v2824_v5 }
 0xe82   :  { %v4633_v6 = vpop.eup %4632 }
 0xe83   :  { %v2855_v7 = vmul.f32 %v4633_v6, %v5231_v24 }
 0xe85   :  { %4394 = vmatmul.mubr.msk.f32.vlgmr.msra.gmra.mrb[36].mxu0 %vm307_vm4, %v2855_v7 }
 0xe86   :  { %v4635_v8 = vpop.eup %4634  ;;  %4402 = vmatpush3.msra.mxu0 %v3091_v1  ;;  %4403 = vmatprep.mubr.msk.f32.mxu0 %vm4683_vm3, %v4680_v21 }
 0xe87   :  { %v2854_v39 = vmul.f32 %v4635_v8, %v5235_v26  ;;  %4411 = vmatprep.subr.mxu0 %v4680_v21 }
 0xe89   :  { %4389 = vmatmul.mubr.msk.f32.vlgmr.msra.gmra.mrb[24].mxu1 %vm307_vm4, %v2854_v39 }
 0xe8a   :  { %4397 = vmatpush3.msra.mxu1 %v3015_v0  ;;  %4398 = vmatprep.mubr.msk.f32.mxu1 %vm4683_vm3, %v4680_v21 }
 0xe8b   :  { %4406 = vmatprep.subr.mxu1 %v4680_v21 }
 0xed0   :  { %v2830_v44 = vpop.xlane.xlu1 %2829 }
 0xed1   :  { %4636 = vrcp.f32 %v2830_v44 }
 0xed4   :  { %v2836_v18 = vpop.xlane.xlu1 %2835 }
 0xed5   :  { %4638 = vrcp.f32 %v2836_v18  ;;  %v2833_v17 = vpop.xlane.xlu0 %2832 }
 0xed6   :  { %4640 = vrcp.f32 %v2833_v17 }
 0xed8   :  { %v2842_v9 = vpop.xlane.xlu1 %2841 }
 0xed9   :  { %4642 = vrcp.f32 %v2842_v9  ;;  %v2839_v10 = vpop.xlane.xlu0 %2838 }
 0xeda   :  { %4644 = vrcp.f32 %v2839_v10 }
 0xedb   :  { %v4637_v11 = vpop.eup %4636 }
 0xedc   :  { %v2856_v12 = vmul.f32 %v4637_v11, %v4621_v52  ;;  %v3395_v26 = vpop.permute.xlu1 %3394 }
 0xedd   :  { %v2845_v13 = vpop.xlane.xlu0 %2844 }
 0xede   :  { %4646 = vrcp.f32 %v2845_v13  ;;  %4399 = vmatmul.mubr.msk.f32.vlgmr.msra.gmra.mrb[26].mxu1 %vm307_vm4, %v2856_v12 }
 0xedf   :  { %v4639_v14 = vpop.eup %4638  ;;  %4407 = vmatpush3.msra.mxu1 %v3167_v2  ;;  %4408 = vmatprep.mubr.msk.f32.mxu1 %vm4683_vm3, %v4680_v21 }
 0xee0   :  { %v4641_v15 = vpop.eup %4640  ;;  %v2858_v16 = vmul.f32 %v4639_v14, %v4623_v56  ;;  %4416 = vmatprep.subr.mxu1 %v4680_v21 }
 0xee1   :  { %v2857_v19 = vmul.f32 %v4641_v15, %v4625_v57  ;;  %v3319_v20 = vpop.permute.xlu0 %3318 }
 0xee2   :  { %4409 = vmatmul.mubr.msk.f32.vlgmr.msra.gmra.mrb[28].mxu1 %vm307_vm4, %v2858_v16 }
 0xee3   :  { %v4643_v22 = vpop.eup %4642  ;;  %4404 = vmatmul.mubr.msk.f32.vlgmr.msra.gmra.mrb[38].mxu0 %vm307_vm4, %v2857_v19  ;;  %4417 = vmatpush3.msra.mxu1 %v3319_v20  ;;  %v4013_v19 = vld [vmem:[%s5418_s10 + $0x28] sm:$0xff] }
 0xee4   :  { %v4645_v23 = vpop.eup %4644  ;;  %v2860_v24 = vmul.f32 %v4643_v22, %v4627_v60  ;;  %4412 = vmatpush3.msra.mxu0 %v3243_v3  ;;  %4413 = vmatprep.mubr.msk.f32.mxu0 %vm4683_vm3, %v4680_v21  ;;  %v4055_v3 = vld [vmem:[%s5415_s7 + $0x1] ss:$0 sm:$0xff]  ;;  %v4014_v22 = vld [vmem:[%s5418_s10 + $0x30] sm:$0xff] }
 0xee5   :  { %v2859_v25 = vmul.f32 %v4645_v23, %v4629_v61  ;;  %4418 = vmatprep.mubr.msk.f32.mxu1 %vm4683_vm3, %v4680_v21  ;;  %4421 = vmatprep.subr.mxu0 %v4680_v21  ;;  %v4015_v23 = vld [vmem:[%s5418_s10 + $0x38] sm:$0xff] }
 0xee6   :  { %4419 = vmatmul.mubr.msk.f32.vlgmr.msra.gmra.mrb[30].mxu1 %vm307_vm4, %v2860_v24  ;;  %4527 = vmatprep.subr.bf16.mxu1 %v4526_v40  ;;  %v4538_v24 = vpack.c.bf16 %v4015_v23, %v4014_v22 }
 0xee7   :  { %4414 = vmatmul.mubr.msk.f32.vlgmr.msra.gmra.mrb[40].mxu0 %vm307_vm4, %v2859_v25  ;;  %4529 = vmatpush3.bf16.msra.mxu1 %v4526_v40  ;;  %v4017_v25 = vld [vmem:[%s5420_s12 + $0x40] sm:$0xff] }
 0xee8   :  { %v4647_v27 = vpop.eup %4646  ;;  %4422 = vmatpush3.msra.mxu0 %v3395_v26  ;;  %4423 = vmatprep.mubr.msk.f32.mxu0 %vm4683_vm3, %v4680_v21  ;;  %v4018_v26 = vld [vmem:[%s5420_s12 + $0x48] sm:$0xff] }
 0xee9   :  { %v2861_v32 = vmul.f32 %v4647_v27, %v5246_v30  ;;  %4531 = vmatprep.subr.bf16.mxu1 %v4530_v43  ;;  %v4019_v27 = vld [vmem:[%s5420_s12 + $0x50] sm:$0xff] }
 0xeeb   :  { %4424 = vmatmul.mubr.msk.f32.vlgmr.msra.gmra.mrb[42].mxu0 %vm307_vm4, %v2861_v32  ;;  %4533 = vmatpush3.bf16.msra.mxu1 %v4530_v43  ;;  %v4542_v32 = vpack.c.bf16 %v4018_v26, %v4017_v25 }
 0xeed   :  { %4543 = vmatprep.subr.bf16.mxu1 %v4542_v32 }
 0xf58   :  { %v3010_v33 = vpop.f32.mrb[36].mxu0 }
 0xf59   :  { %v4395_v34 = vpop.f32.mrb[37].mxu0 }
 0xf5c   :  { %v2934_v35 = vpop.f32.mrb[24].mxu1 }
 0xf5d   :  { %v4390_v36 = vpop.f32.mrb[25].mxu1 }
 0xf5e   :  { %v4022_v36 = vld [vmem:[%s5420_s12 + $0x68] sm:$0xff] }
 0xfb1   :  { %v3086_v45 = vpop.f32.mrb[26].mxu1 }
 0xfb2   :  { %v4400_v46 = vpop.f32.mrb[27].mxu1  ;;  %3472 = vrot.lane.b32.xlu0 %v3086_v45, %s4687_s19 }
 0xfb5   :  { %v3238_v47 = vpop.f32.mrb[28].mxu1 }
 0xfb6   :  { %v3162_v48 = vpop.f32.mrb[38].mxu0  ;;  %3480 = vrot.lane.b32.xlu0 %v3238_v47, %s5438_s25  ;;  %v4410_v49 = vpop.f32.mrb[29].mxu1  ;;  %v4058_v47 = vld [vmem:[%s5416_s8 + $0x1] ss:$0 sm:$0xff] }
 0xfb7   :  { %3474 = vrot.lane.b32.xlu1 %v3162_v48, %s4687_s19  ;;  %v4405_v50 = vpop.f32.mrb[39].mxu0  ;;  %v4059_v49 = vld [vmem:[%s5417_s9 + $0x1] ss:$0 sm:$0xff] }
 0xfb9   :  { %v3390_v51 = vpop.f32.mrb[30].mxu1 }
 0xfba   :  { %v3314_v52 = vpop.f32.mrb[40].mxu0  ;;  %3488 = vrot.lane.b32.xlu0 %v3390_v51, %s5439_s26  ;;  %v4420_v53 = vpop.f32.mrb[31].mxu1 }
 0xfbb   :  { %3482 = vrot.lane.b32.xlu1 %v3314_v52, %s5438_s25  ;;  %v4415_v54 = vpop.f32.mrb[41].mxu0 }
 0xfbe   :  { %v3466_v55 = vpop.f32.mrb[42].mxu0 }
 0xfbf   :  { %3490 = vrot.lane.b32.xlu1 %v3466_v55, %s5439_s26  ;;  %v4425_v56 = vpop.f32.mrb[43].mxu0 }
 0xfc0   :  { %v4023_v56 = vld [vmem:[%s5420_s12 + $0x70] sm:$0xff] }
0x1024   :  { %v3473_v57 = vpop.permute.xlu0 %3472 }
0x1025   :  { %v3494_v60 = vsel %vm307_vm4, %v2934_v35, %v3473_v57  ;;  %v4021_v35 = vld [vmem:[%s5420_s12 + $0x60] sm:$0xff]  ;;  %v4024_v57 = vld [vmem:[%s5420_s12 + $0x78] sm:$0xff] }
0x1026   :  { %v4550_v37 = vpack.c.bf16 %v4022_v36, %v4021_v35 }
0x1028   :  { %v3481_v58 = vpop.permute.xlu0 %3480 }
0x1029   :  { %v3475_v59 = vpop.permute.xlu1 %3474  ;;  %v3496_v61 = vsel %vm1644_vm5, %v3494_v60, %v3481_v58  ;;  %v4554_v58 = vpack.c.bf16 %v4024_v57, %v4023_v56 }
0x102a   :  { %v3495_v63 = vsel %vm307_vm4, %v3010_v33, %v3475_v59  ;;  %v4020_v33 = vld [vmem:[%s5420_s12 + $0x58] sm:$0xff]  ;;  %v4060_v59 = vld [vmem:[%s5419_s11 + $0x1] ss:$0 sm:$0xff] }
0x102b   :  { %v4546_v34 = vpack.c.bf16 %v4020_v33, %v4019_v27  ;;  %v4066_v33 = vld [vmem:[%s5422_s14 + $0x1] ss:$0 sm:$0xff]  ;;  %s4691_s14 = smov [#allocation2]  }
0x102c   :  { %v3489_v62 = vpop.permute.xlu0 %3488  ;;  %s3948_s6 = sshll.u32 %s4691_s14, 4  ;;  %s3949_s6 = int_to_ptr.vmem [resolvable:$true] %s3948_s6 }
0x102d   :  { %v3498_v29 = vsel %vm1647_vm6, %v3496_v61, %v3489_v62  ;;  %v3483_v30 = vpop.permute.xlu1 %3482  ;;  %p4661_p1 = scmp.lt.s32.totalorder %s3949_s6, %s3949_s6 }
0x102e   :  { %4434 = vmatprep.mubr.msk.f32.mxu1 %vm195_vm2, %v3498_v29  ;;  %v3497_v0 = vsel %vm1644_vm5, %v3495_v63, %v3483_v30  ;;  %v4063_v63 = vld [vmem:[%s5421_s13 + $0x1] ss:$0 sm:$0xff] }
0x1031   :  { %v3491_v1 = vpop.permute.xlu1 %3490 }
0x1032   :  { %v3499_v2 = vsel %vm1647_vm6, %v3497_v0, %v3491_v1 }
0x1033   :  { %4435 = vmatmul.mubr.msk.f32.vlgmr.msra.gmra.mrb[32].mxu1 %vm195_vm2, %v3499_v2 }
0x1034   :  { %4545 = vmatpush3.bf16.msra.mxu1 %v4542_v32 }
0x1035   :  { %4547 = vmatprep.subr.bf16.mxu1 %v4546_v34 }
0x1038   :  { %4549 = vmatpush3.bf16.msra.mxu1 %v4546_v34 }
0x1039   :  { %4551 = vmatprep.subr.bf16.mxu1 %v4550_v37 }
0x103c   :  { %4553 = vmatpush3.bf16.msra.mxu1 %v4550_v37  ;;  %v4067_v37 = vld [vmem:[%s5423_s15 + $0x1] ss:$0 sm:$0xff]  ;;  %s4656_s15 = scalar_lea.vmem %s3949_s6, 32 }
0x103d   :  { %4555 = vmatprep.subr.bf16.mxu1 %v4554_v58  ;;  %p4657_p0 = scmp.ne.s32.totalorder %s3949_s6, %s4656_s15  ;;  %p4662_p2 = scmp.lt.s32.totalorder %s4656_s15, %s4656_s15 }
0x103f   :  { %p4663_p3 = por %p4662_p2, %p4661_p1 }
0x1040   :  { %4557 = vmatpush3.bf16.msra.mxu1 %v4554_v58 }
0x1041   :  { %p4664_p4 = pnand %p4663_p3, %p4657_p0 }
0x1106   :  { %v4436_v4 = vpop.f32.mrb[32].mxu1 }
0x1107   :  { %v3584_v5 = vadd.f32 %v4436_v4, %v4055_v3  ;;  %v3578_v6 = vpop.f32.mrb[33].mxu1 }
0x1108   :  { %v3579_v7 = vadd.f32 %v4055_v3, %v3578_v6 }
0x1109   :  { %v3588_v8 = vadd.f32 %v3584_v5, %v5108_v31 }
0x110a   :  { %v3587_v39 = vadd.f32 %v3579_v7, %v5106_v28  ;;  %v4012_v28 = vld [vmem:[%s5418_s10 + $0x20] sm:$0xff] }
0x110b   :  { %v3592_v44 = vsel %vm195_vm2, %v3588_v8, 0.0  ;;  %v4534_v20 = vpack.c.bf16 %v4013_v19, %v4012_v28  ;;  %v3854_v19 = vld [vmem:[%s5424_s16 + $0x18] sm:$0xff] }
0x110c   :  { %3593 = vadd.xlane.f32.xlu1 %v3592_v44  ;;  %v3589_v18 = vsel %vm195_vm2, %v3587_v39, 0.0 }
0x110d   :  { %3590 = vadd.xlane.f32.xlu0 %v3589_v18  ;;  %4535 = vmatprep.subr.bf16.mxu0 %v4534_v20 }
0x110e   :  { %4537 = vmatpush3.bf16.msra.mxu0 %v4534_v20 }
0x110f   :  { %4539 = vmatprep.subr.bf16.mxu0 %v4538_v24 }
0x1112   :  { %4541 = vmatpush3.bf16.msra.mxu0 %v4538_v24 }
0x1199   :  { %v3594_v17 = vpop.xlane.xlu1 %3593 }
0x119a   :  { %v3596_v9 = vmul.f32 0.03125, %v3594_v17  ;;  %v3591_v10 = vpop.xlane.xlu0 %3590 }
0x119b   :  { %v3595_v11 = vmul.f32 0.03125, %v3591_v10 }
0x119c   :  { %v3598_v12 = vsub.f32 %v3588_v8, %v3596_v9 }
0x119d   :  { %v3597_v13 = vsub.f32 %v3587_v39, %v3595_v11 }
0x119e   :  { %v3600_v16 = vmul.f32 %v3598_v12, %v3598_v12 }
0x119f   :  { %v3599_v14 = vmul.f32 %v3597_v13, %v3597_v13 }
0x11a0   :  { %v3604_v31 = vsel %vm195_vm2, %v3600_v16, 0.0  ;;  %v3853_v16 = vld [vmem:[%s5424_s16 + $0x10] sm:$0xff] }
0x11a1   :  { %v3601_v15 = vsel %vm195_vm2, %v3599_v14, 0.0  ;;  %v3851_v14 = vld [vmem:[%s5424_s16] sm:$0xff]  ;;  %v4562_v20 = vpack.c.bf16 %v3854_v19, %v3853_v16 }
0x11a2   :  { %3602 = vadd.xlane.f32.xlu0 %v3601_v15  ;;  %v3852_v15 = vld [vmem:[%s5424_s16 + $0x8] sm:$0xff] }
0x11a3   :  { %v4559_v28 = vpack.c.bf16 %v3852_v15, %v3851_v14 }
0x11a6   :  { %3605 = vadd.xlane.f32.xlu0 %v3604_v31  ;;  %v4690_v31 = vmov 0.0|0.0  }
0x11a7   :  { %4558 = vmatprep.subr.bf16.mxu0 %v4690_v31 }
0x122f   :  { %v3603_v38 = vpop.xlane.xlu0 %3602 }
0x1230   :  { %v3607_v40 = vmul.f32 0.03125, %v3603_v38 }
0x1232   :  { %v3609_v41 = vadd.f32 1e-05, %v3607_v40 }
0x1233   :  { %v3606_v42 = vpop.xlane.xlu0 %3605 }
0x1234   :  { %4648 = vrsqrt.f32 %v3609_v41  ;;  %v3608_v43 = vmul.f32 0.03125, %v3606_v42 }
0x1236   :  { %v3610_v45 = vadd.f32 1e-05, %v3608_v43 }
0x1238   :  { %4650 = vrsqrt.f32 %v3610_v45 }
0x123e   :  { %v4649_v46 = vpop.eup %4648 }
0x123f   :  { %v3613_v48 = vmul.f32 %v4649_v46, %v3597_v13 }
0x1241   :  { %v3621_v50 = vmul.f32 %v4058_v47, %v3613_v48 }
0x1242   :  { %v4651_v51 = vpop.eup %4650 }
0x1243   :  { %v3614_v52 = vmul.f32 %v4651_v51, %v3598_v12  ;;  %v3629_v53 = vadd.f32 %v4059_v49, %v3621_v50 }
0x1245   :  { %v3622_v54 = vmul.f32 %v4058_v47, %v3614_v52  ;;  %4445 = vmatprep.mubr.msk.f32.mxu0 %vm195_vm2, %v3629_v53  ;;  %v4068_v47 = vld [vmem:[%s5425_s17] ss:$0 sm:$0xff] }
0x1247   :  { %v3630_v55 = vadd.f32 %v4059_v49, %v3622_v54 }
0x1249   :  { %4446 = vmatmul.mubr.msk.f32.vlgmr.msra.gmra.mrb[44].mxu0 %vm195_vm2, %v3630_v55 }
0x124a   :  { %4475 = vmatprep.mubr.msk.f32.mxu0 %vm4683_vm3, %v4680_v21  ;;  %4560 = vmatpush3.bf16.msra.mxu0 %v4559_v28 }
0x124b   :  { %4561 = vmatprep.subr.bf16.mxu0 %v4690_v31 }
0x124e   :  { %4563 = vmatpush3.bf16.msra.mxu0 %v4562_v20 }
0x131c   :  { %v4447_v60 = vpop.f32.mrb[44].mxu0 }
0x131d   :  { %v3715_v61 = vadd.f32 %v4447_v60, %v4060_v59  ;;  %v3709_v62 = vpop.f32.mrb[45].mxu0 }
0x131e   :  { %v3710_v29 = vadd.f32 %v4060_v59, %v3709_v62 }
0x131f   :  { %v3719_v30 = vmax.f32 %v3715_v61, 0.0 }
0x1320   :  { %v3718_v21 = vmax.f32 %v3710_v29, 0.0 }
0x1322   :  { %4464 = vmatprep.mubr.msk.f32.mxu1 %vm1877_vm7, %v3718_v21 }
0x1323   :  { %4465 = vmatmul.mubr.msk.f32.vlgmr.msra.gmra.mrb[34].mxu1 %vm1877_vm7, %v3719_v30 }
0x13f6   :  { %v4466_v0 = vpop.f32.mrb[34].mxu1 }
0x13f7   :  { %v3804_v1 = vadd.f32 %v4466_v0, %v4063_v63  ;;  %v3798_v2 = vpop.f32.mrb[35].mxu1 }
0x13f8   :  { %v3799_v3 = vadd.f32 %v4063_v63, %v3798_v2 }
0x13f9   :  { %v3808_v4 = vadd.f32 %v3804_v1, %v3630_v55 }
0x13fa   :  { %v3807_v5 = vadd.f32 %v3799_v3, %v3629_v53 }
0x13fb   :  { %v3812_v6 = vsel %vm195_vm2, %v3808_v4, 0.0 }
0x13fc   :  { %3813 = vadd.xlane.f32.xlu0 %v3812_v6  ;;  %v3809_v7 = vsel %vm195_vm2, %v3807_v5, 0.0 }
0x13fd   :  { %3810 = vadd.xlane.f32.xlu1 %v3809_v7 }
0x1489   :  { %v3814_v8 = vpop.xlane.xlu0 %3813 }
0x148a   :  { %v3816_v39 = vmul.f32 0.03125, %v3814_v8  ;;  %v3811_v44 = vpop.xlane.xlu1 %3810 }
0x148b   :  { %v3815_v18 = vmul.f32 0.03125, %v3811_v44 }
0x148c   :  { %v3818_v17 = vsub.f32 %v3808_v4, %v3816_v39 }
0x148d   :  { %v3817_v9 = vsub.f32 %v3807_v5, %v3815_v18 }
0x148e   :  { %v3820_v10 = vmul.f32 %v3818_v17, %v3818_v17 }
0x148f   :  { %v3819_v11 = vmul.f32 %v3817_v9, %v3817_v9 }
0x1490   :  { %v3824_v12 = vsel %vm195_vm2, %v3820_v10, 0.0 }
0x1491   :  { %3825 = vadd.xlane.f32.xlu0 %v3824_v12  ;;  %v3821_v13 = vsel %vm195_vm2, %v3819_v11, 0.0 }
0x1492   :  { %3822 = vadd.xlane.f32.xlu1 %v3821_v13 }
0x151e   :  { %v3826_v22 = vpop.xlane.xlu0 %3825 }
0x151f   :  { %v3828_v23 = vmul.f32 0.03125, %v3826_v22  ;;  %v3823_v24 = vpop.xlane.xlu1 %3822 }
0x1520   :  { %v3827_v25 = vmul.f32 0.03125, %v3823_v24 }
0x1521   :  { %v3830_v26 = vadd.f32 1e-05, %v3828_v23 }
0x1522   :  { %v3829_v27 = vadd.f32 1e-05, %v3827_v25 }
0x1523   :  { %4652 = vrsqrt.f32 %v3830_v26 }
0x1524   :  { %4654 = vrsqrt.f32 %v3829_v27 }
0x152d   :  { %v4653_v32 = vpop.eup %4652 }
0x152e   :  { %v4655_v34 = vpop.eup %4654  ;;  %v3834_v35 = vmul.f32 %v4653_v32, %v3818_v17 }
0x152f   :  { %v3833_v36 = vmul.f32 %v4655_v34, %v3817_v9 }
0x1530   :  { %v3842_v38 = vmul.f32 %v4066_v33, %v3834_v35 }
0x1531   :  { %v3841_v40 = vmul.f32 %v4066_v33, %v3833_v36 }
0x1532   :  { %v3850_v41 = vadd.f32 %v4067_v37, %v3842_v38 }
0x1533   :  { %v3849_v42 = vadd.f32 %v4067_v37, %v3841_v40 }
0x1534   :  { %v3865_v43 = vrot.slane %v3850_v41, 6 }
0x1535   :  { %v3864_v45 = vrot.slane %v3849_v42, 7 }
0x1537   :  { %v3867_v46 = vsel %vm3866_vm8, %v3865_v43, %v3864_v45 }
0x1538   :  { %4476 = vmatmul.mubr.msk.f32.vlgmr.msra.gmra.mrb[46].mxu0 %vm195_vm2, %v3867_v46 }
0x160b   :  { %v3936_v48 = vpop.f32.mrb[46].mxu0 }
0x160c   :  { %v3937_v49 = vadd.f32 %v4068_v47, %v3936_v48  ;;  %v4477_v50 = vpop.f32.mrb[47].mxu0 }
0x160e   :  { %3941 = vst.msk [vmem:[#allocation2] sm:$0x3] %vm3940_vm9, %v3937_v49 }
0x160f   :  { %4667 = shalt.err (!%p4664_p4)
}
0x1610   :  { %s4668_s27 = scalar_lea.hbm %s5426_s18, 32 }
0x1611   :  { %p4669_p5 = scmp.ne.s32.totalorder %s5426_s18, %s4668_s27  ;;  %p4672_p6 = scmp.lt.u32.totalorder %s4668_s27, %s5426_s18 }
0x1613   :  { %p4674_p7 = pnand %p4672_p6, %p4669_p5 }
0x1615   :  { %4677 = shalt.err (!%p4674_p7)
}
0x1616   :  { %3951 = dma.vmem_to_hbm [thread:$0]  %s3949_s6, 32, %s5426_s18, [#allocation3]  }
0x1617   :  { %4678 = dma.done.wait [#allocation3], 32  }
0x1618   :  { %4679 = vsyncadd [#allocation3], 4294967264 }
0x1619   :  { %3955 = vsyncpa [#allocation3], 1 }

</bundles_post_ra>
